<compile_context>
chip_gen: v5e
topology: v5e:2x2
jax: 0.10.0
libtpu: 0.0.40
codegen_flags: <defaults>
</compile_context>

<pallas_src>
import jax
import jax.numpy as jnp
from jax.experimental import pallas as pl
from jax.experimental.pallas import tpu as pltpu


def _round_up(x, m):
    return ((x + m - 1) // m) * m


# ----------------------------------------------------------------------------
# Pallas kernel: one batch tile per grid step.
#   Recurrent state is vreg-resident as a lane-packed (Bt, 2H) array
#   [h_fwd | h_bwd]; per-step outputs are streamed to a VMEM scratch `att`.
# ----------------------------------------------------------------------------
def lstm_aggregator_kernel(
    x_ref,       # (Bt, N, Din)
    adj_ref,     # (Bt, N, NP)   adjacency, columns zero-padded to NP
    wih_ref,     # (Din, 6H)     columns [r_f | r_b | z_f | z_b | n_f | n_b]
    bih_ref,     # (1, 6H)       b_ih (+ b_hh folded for the r and z gates)
    wr_ref,      # (2H, 2H)      blockdiag(W_hr_f^T, W_hr_b^T)
    wz_ref,      # (2H, 2H)
    wn_ref,      # (2H, 2H)
    bhn_ref,     # (1, 2H)       [b_hh_n_f | b_hh_n_b]
    wlin_ref,    # (DP, NP)      linear_mapping weight, zero-padded
    blin_ref,    # (1, NP)
    out_ref,     # (Bt, N, DP)   DP = 2H padded up to a multiple of 128
    att_ref,     # VMEM scratch (Bt, N, DP)
):
    Bt, N, Din = x_ref.shape
    H2 = wr_ref.shape[0]          # 2H (packed fwd|bwd hidden width)
    H = H2 // 2
    DP = att_ref.shape[2]
    NP = wlin_ref.shape[1]
    f32 = jnp.float32

    # Pad lanes of the att scratch must be zero (they feed the final einsum,
    # and uninitialized VMEM could hold inf/nan bit patterns).
    att_ref[...] = jnp.zeros_like(att_ref)

    # ---- prologue: ONE fused input projection for both directions ----------
    x2 = x_ref[...].reshape(Bt * N, Din)
    gx = (jnp.dot(x2, wih_ref[...], preferred_element_type=f32)
          + bih_ref[...]).reshape(Bt, N, 3 * H2)
    gxr = gx[:, :, 0:H2]
    gxz = gx[:, :, H2:2 * H2]
    gxn = gx[:, :, 2 * H2:3 * H2]

    Wr = wr_ref[...]
    Wz = wz_ref[...]
    Wn = wn_ref[...]
    bhn = bhn_ref[...]

    # Lanes [0, H) carry the forward chain; lanes [H, 2H) carry the backward
    # chain (which walks the sequence in reverse).
    is_fwd = jax.lax.broadcasted_iota(jnp.int32, (Bt, H2), 1) < H

    # TODO(synk): for very small Bt one could additionally lane-pack 2 batch
    # sub-rows per vreg (4 chains / 128 lanes); not implemented here.
    h = jnp.zeros((Bt, H2), f32)       # packed [h_fwd | h_bwd], vreg-resident
    for i in range(N):                 # fully unrolled; static indices only
        t = N - 1 - i
        # Gate inputs: forward lanes read time i, backward lanes read time t
        # (off the serial chain -> scheduler fills idle slots).
        gr = jnp.where(is_fwd, gxr[:, i, :], gxr[:, t, :])
        gz = jnp.where(is_fwd, gxz[:, i, :], gxz[:, t, :])
        gn = jnp.where(is_fwd, gxn[:, i, :], gxn[:, t, :])
        # Serial chain: 3 packed matmuls + gate math on 2H lanes.
        ghr = jnp.dot(h, Wr, preferred_element_type=f32)
        ghz = jnp.dot(h, Wz, preferred_element_type=f32)
        ghn = jnp.dot(h, Wn, preferred_element_type=f32) + bhn
        r = jax.nn.sigmoid(gr + ghr)
        z = jax.nn.sigmoid(gz + ghz)
        n = jnp.tanh(gn + r * ghn)
        h = n + z * (h - n)            # == (1 - z) * n + z * h
        # Stream per-step outputs to VMEM (store slot, off the serial chain).
        att_ref[:, i, 0:H] = h[:, 0:H]        # forward output at time i
        att_ref[:, t, H:H2] = h[:, H:H2]      # backward output at time t

    # ---- epilogue: linear_mapping -> adjacency mask -> softmax -> aggregate
    att = att_ref[...]                         # (Bt, N, DP); lanes >= 2H are 0
    scores = (jnp.dot(att.reshape(Bt * N, DP), wlin_ref[...],
                      preferred_element_type=f32)
              + blin_ref[...]).reshape(Bt, N, NP)
    # Exact 0/1 adjacency assumed (matches the PyTorch module).  Padded
    # adjacency columns are 0 -> masked -> vanish under softmax.
    scores = jnp.where(adj_ref[...] == 0.0, f32(-9999999.0), scores)
    m = jnp.max(scores, axis=-1, keepdims=True)
    e = jnp.exp(scores - m)
    denom = jnp.sum(e, axis=-1, keepdims=True)
    inv = pl.reciprocal(denom, approx=True)
    inv = inv * (2.0 - denom * inv)            # Newton step -> ~f32 accuracy
    p = (e * inv)[:, :, 0:N]                   # drop pad columns
    out_ref[...] = jnp.einsum("bij,bjd->bid", p, att,
                              preferred_element_type=f32).astype(out_ref.dtype)


# ----------------------------------------------------------------------------
# Wrapper
# ----------------------------------------------------------------------------
def lstm_aggregator_forward(node_features, adj_list, params, add_self,
                            batch_tile=None):
    B, N, Din = node_features.shape
    H = params["w_hh_f"].shape[1]
    A = params["w_lin"].shape[0]
    assert A == N, "agent_num must equal sequence length for the masking"
    H2 = 2 * H
    DP = _round_up(H2, 128)       # lane-dense feature dim for att / output
    NP = _round_up(N, 128)        # lane-dense score columns for the softmax
    f32 = jnp.float32

    if add_self:  # glue: adj_list + eye (trivial elementwise, stays in JAX)
        adj_list = adj_list + jnp.eye(N, dtype=adj_list.dtype)[None]
    # Pad score columns with zeros: the kernel masks them to -9999999 and
    # they vanish under softmax.
    adj_p = jnp.zeros((B, N, NP), adj_list.dtype).at[:, :, :N].set(adj_list)

    # ---- host-side weight prep (gate order [r, z, n], PyTorch convention) --
    def w_gate(w, g):   # (3H, X) -> transposed gate block (X, H)
        return w[g * H:(g + 1) * H, :].T.astype(f32)

    def b_gate(b, g):
        return b[:, g * H:(g + 1) * H].astype(f32)

    # Fused input projection, packed column order [r_f|r_b|z_f|z_b|n_f|n_b].
    wih_all = jnp.concatenate(
        [w_gate(params["w_ih_f"], 0), w_gate(params["w_ih_b"], 0),
         w_gate(params["w_ih_f"], 1), w_gate(params["w_ih_b"], 1),
         w_gate(params["w_ih_f"], 2), w_gate(params["w_ih_b"], 2)], axis=1)
    # Fold b_hh into b_ih for the r and z gates only (NOT the n gate).
    bih_all = jnp.concatenate(
        [b_gate(params["b_ih_f"], 0) + b_gate(params["b_hh_f"], 0),
         b_gate(params["b_ih_b"], 0) + b_gate(params["b_hh_b"], 0),
         b_gate(params["b_ih_f"], 1) + b_gate(params["b_hh_f"], 1),
         b_gate(params["b_ih_b"], 1) + b_gate(params["b_hh_b"], 1),
         b_gate(params["b_ih_f"], 2),
         b_gate(params["b_ih_b"], 2)], axis=1)
    bhn = jnp.concatenate(
        [b_gate(params["b_hh_f"], 2), b_gate(params["b_hh_b"], 2)], axis=1)

    def blockdiag(a, b):
        z01 = jnp.zeros((a.shape[0], b.shape[1]), f32)
        z10 = jnp.zeros((b.shape[0], a.shape[1]), f32)
        return jnp.concatenate(
            [jnp.concatenate([a, z01], axis=1),
             jnp.concatenate([z10, b], axis=1)], axis=0)

    Wr = blockdiag(w_gate(params["w_hh_f"], 0), w_gate(params["w_hh_b"], 0))
    Wz = blockdiag(w_gate(params["w_hh_f"], 1), w_gate(params["w_hh_b"], 1))
    Wn = blockdiag(w_gate(params["w_hh_f"], 2), w_gate(params["w_hh_b"], 2))

    wlin_p = jnp.zeros((DP, NP), f32).at[:H2, :N].set(params["w_lin"].T)
    blin_p = jnp.zeros((1, NP), f32).at[:, :N].set(params["b_lin"])

    # ---- batch tiling -------------------------------------------------------
    # Default: whole batch in one grid block (v5e/v6e have a single
    # TensorCore; splitting only shrinks M and adds per-step overhead).
    # Split in two (v7x megacore) only when each block keeps >= 32 rows.
    if batch_tile is None:
        batch_tile = B
        if B % 2 == 0 and (B // 2) >= 32:
            batch_tile = B // 2
    Bt = batch_tile
    assert B % Bt == 0
    grid = (B // Bt,)

    def full(shape):
        nd = len(shape)
        return pl.BlockSpec(shape, lambda b, _nd=nd: (0,) * _nd)

    grid_spec = pltpu.PrefetchScalarGridSpec(
        num_scalar_prefetch=0,
        grid=grid,
        in_specs=[
            pl.BlockSpec((Bt, N, Din), lambda b: (b, 0, 0)),   # node_features
            pl.BlockSpec((Bt, N, NP), lambda b: (b, 0, 0)),    # adjacency (padded)
            full((Din, 3 * H2)), full((1, 3 * H2)),
            full((H2, H2)), full((H2, H2)), full((H2, H2)), full((1, H2)),
            full((DP, NP)), full((1, NP)),
        ],
        out_specs=pl.BlockSpec((Bt, N, DP), lambda b: (b, 0, 0)),
        scratch_shapes=[pltpu.VMEM((Bt, N, DP), f32)],
    )

    flops = int(
        2 * B * N * Din * 3 * H2            # fused input projection
        + 2 * B * N * 3 * H2 * H2           # recurrent matmuls (3 per step)
        + 2 * B * N * DP * NP               # attention scores
        + 2 * B * N * N * DP)               # aggregation
    transcendentals = int(B * N * (3 * H2 + NP) + B * N)
    weight_bytes = 4 * (wih_all.size + bih_all.size + 3 * H2 * H2 + H2
                        + DP * NP + NP)
    bytes_accessed = int(4 * (B * N * Din + B * N * NP + B * N * DP)
                         + weight_bytes)

    # Scoped-VMEM guard: only raised when a large Bt would exceed the default
    # (v7x has 64 MiB physical / 32 MiB default scoped VMEM).
    vmem_est = 4 * 2 * Bt * N * (Din + NP + 2 * DP) + 2 * weight_bytes
    cp_kwargs = dict(dimension_semantics=("parallel",))
    if vmem_est > 28 * 1024 * 1024:
        cp_kwargs["vmem_limit_bytes"] = int(min(vmem_est + (4 << 20), 100 << 20))

    out_padded = pl.pallas_call(
        lstm_aggregator_kernel,
        out_shape=jax.ShapeDtypeStruct((B, N, DP), f32),
        grid_spec=grid_spec,
        compiler_params=pltpu.CompilerParams(**cp_kwargs),
        cost_estimate=pl.CostEstimate(
            flops=flops, transcendentals=transcendentals,
            bytes_accessed=bytes_accessed),
    )(node_features, adj_p, wih_all, bih_all, Wr, Wz, Wn, bhn, wlin_p, blin_p)

    return out_padded[:, :, :H2]      # drop feature pad lanes


# ----------------------------------------------------------------------------
# Pure-JAX reference (for correctness check)
# ----------------------------------------------------------------------------
def reference_forward(x, adj, params, add_self):
    B, N, _ = x.shape
    H = params["w_hh_f"].shape[1]
    if add_self:
        adj = adj + jnp.eye(N, dtype=adj.dtype)[None]

    def gru_dir(xb, wih, whh, bih, bhh, reverse):
        gx = xb @ wih.T + bih
        h = jnp.zeros((H,), jnp.float32)
        outs = [None] * N
        order = range(N - 1, -1, -1) if reverse else range(N)
        for t in order:
            gh = whh @ h + bhh
            r = jax.nn.sigmoid(gx[t, :H] + gh[:H])
            z = jax.nn.sigmoid(gx[t, H:2 * H] + gh[H:2 * H])
            n = jnp.tanh(gx[t, 2 * H:] + r * gh[2 * H:])
            h = (1.0 - z) * n + z * h
            outs[t] = h
        return jnp.stack(outs)

    outs = []
    for b in range(B):
        fwd = gru_dir(x[b], params["w_ih_f"], params["w_hh_f"],
                      params["b_ih_f"][0], params["b_hh_f"][0], False)
        bwd = gru_dir(x[b], params["w_ih_b"], params["w_hh_b"],
                      params["b_ih_b"][0], params["b_hh_b"][0], True)
        att = jnp.concatenate([fwd, bwd], axis=-1)
        scores = att @ params["w_lin"].T + params["b_lin"][0]
        scores = jnp.where(adj[b] == 0.0, -9999999.0, scores)
        p = jax.nn.softmax(scores, axis=-1)
        outs.append(p @ att)
    return jnp.stack(outs)


# ----------------------------------------------------------------------------
# Deterministic parameter init (shapes from the module's __init__)
# ----------------------------------------------------------------------------
def init_params(key, input_dim, output_dim, agent_num):
    H = output_dim
    k = 1.0 / jnp.sqrt(jnp.float32(H))
    ks = jax.random.split(key, 10)
    u = lambda kk, shape: jax.random.uniform(kk, shape, jnp.float32, -k, k)
    return {
        # bidirectional GRU, layer 0 (gate order [r, z, n], PyTorch convention)
        "w_ih_f": u(ks[0], (3 * H, input_dim)),
        "w_hh_f": u(ks[1], (3 * H, H)),
        "b_ih_f": u(ks[2], (1, 3 * H)),
        "b_hh_f": u(ks[3], (1, 3 * H)),
        "w_ih_b": u(ks[4], (3 * H, input_dim)),
        "w_hh_b": u(ks[5], (3 * H, H)),
        "b_ih_b": u(ks[6], (1, 3 * H)),
        "b_hh_b": u(ks[7], (1, 3 * H)),
        # linear_mapping: (2H -> agent_num)
        "w_lin": u(ks[8], (agent_num, 2 * H)),
        "b_lin": u(ks[9], (1, agent_num)),
    }


if __name__ == "__main__":
    B, agent_num, input_dim, output_dim = 2, 8, 4, 32
    add_self = True

    root = jax.random.PRNGKey(0)
    k_par, k_x, k_adj = jax.random.split(root, 3)

    params = init_params(k_par, input_dim, output_dim, agent_num)
    node_features = jax.random.normal(k_x, (B, agent_num, input_dim), jnp.float32)
    adj_list = jax.random.bernoulli(
        k_adj, 0.5, (B, agent_num, agent_num)).astype(jnp.float32)
    # The `nodes` argument of the PyTorch forward is unused; it is omitted.

    out = lstm_aggregator_forward(node_features, adj_list, params, add_self)
    out = jax.block_until_ready(out)

    ref = reference_forward(node_features, adj_list, params, add_self)
    assert out.shape == (B, agent_num, 2 * output_dim)
    assert jnp.allclose(out, ref, rtol=1e-4, atol=1e-4), (
        f"max abs err {jnp.max(jnp.abs(out - ref))}"
    )
    print("KERNEL_OK")
</pallas_src>

<mosaic_0001>
module attributes {stable_mosaic.version = 11 : i64} {
  func.func @lstm_aggregator_kernel(%arg0: i32, %arg1: memref<2x8x4xf32, #tpu.memory_space<vmem>>, %arg2: memref<2x8x128xf32, #tpu.memory_space<vmem>>, %arg3: memref<4x192xf32, #tpu.memory_space<vmem>>, %arg4: memref<1x192xf32, #tpu.memory_space<vmem>>, %arg5: memref<64x64xf32, #tpu.memory_space<vmem>>, %arg6: memref<64x64xf32, #tpu.memory_space<vmem>>, %arg7: memref<64x64xf32, #tpu.memory_space<vmem>>, %arg8: memref<1x64xf32, #tpu.memory_space<vmem>>, %arg9: memref<128x128xf32, #tpu.memory_space<vmem>>, %arg10: memref<1x128xf32, #tpu.memory_space<vmem>>, %arg11: memref<2x8x128xf32, #tpu.memory_space<vmem>>, %arg12: memref<2x8x128xf32, #tpu.memory_space<vmem>>) attributes {dimension_semantics = [#tpu.dimension_semantics<parallel>], iteration_bounds = array<i64: 1>, scalar_prefetch = 0 : i64, scratch_operands = 1 : i64, tpu.core_type = #tpu.core_type<tc>, window_params = [{transform_indices = @transform_0, window_bounds = array<i64: 2, 8, 4>}, {transform_indices = @transform_1, window_bounds = array<i64: 2, 8, 128>}, {pipeline_mode = #tpu.pipeline_mode<synchronous>, transform_indices = @transform_2, window_bounds = array<i64: 4, 192>}, {pipeline_mode = #tpu.pipeline_mode<synchronous>, transform_indices = @transform_3, window_bounds = array<i64: 1, 192>}, {pipeline_mode = #tpu.pipeline_mode<synchronous>, transform_indices = @transform_4, window_bounds = array<i64: 64, 64>}, {pipeline_mode = #tpu.pipeline_mode<synchronous>, transform_indices = @transform_5, window_bounds = array<i64: 64, 64>}, {pipeline_mode = #tpu.pipeline_mode<synchronous>, transform_indices = @transform_6, window_bounds = array<i64: 64, 64>}, {pipeline_mode = #tpu.pipeline_mode<synchronous>, transform_indices = @transform_7, window_bounds = array<i64: 1, 64>}, {pipeline_mode = #tpu.pipeline_mode<synchronous>, transform_indices = @transform_8, window_bounds = array<i64: 128, 128>}, {pipeline_mode = #tpu.pipeline_mode<synchronous>, transform_indices = @transform_9, window_bounds = array<i64: 1, 128>}, {transform_indices = @transform_10, window_bounds = array<i64: 2, 8, 128>}]} {
    %cst = arith.constant 0.000000e+00 : f32
    %0 = vector.broadcast %cst : f32 to vector<2x8x128xf32>
    %c0 = arith.constant 0 : index
    %c0_0 = arith.constant 0 : index
    %c0_1 = arith.constant 0 : index
    %1 = vector.load %arg12[%c0, %c0_0, %c0_1] : memref<2x8x128xf32, #tpu.memory_space<vmem>>, vector<2x8x128xf32>
    tpu.vector_store %arg12[%c0, %c0_0, %c0_1], %0 {strides = array<i32>} : memref<2x8x128xf32, #tpu.memory_space<vmem>>, vector<2x8x128xf32>,
    %c0_2 = arith.constant 0 : index
    %c0_3 = arith.constant 0 : index
    %c0_4 = arith.constant 0 : index
    %2 = vector.load %arg1[%c0_2, %c0_3, %c0_4] : memref<2x8x4xf32, #tpu.memory_space<vmem>>, vector<2x8x4xf32>
    %3 = vector.shape_cast %2 : vector<2x8x4xf32> to vector<16x4xf32>
    %c0_5 = arith.constant 0 : index
    %c0_6 = arith.constant 0 : index
    %4 = vector.load %arg3[%c0_5, %c0_6] : memref<4x192xf32, #tpu.memory_space<vmem>>, vector<4x192xf32>
    %cst_7 = arith.constant dense<0.000000e+00> : vector<16x192xf32>
    %5 = tpu.matmul %3, %4, %cst_7 {dimension_numbers = #tpu.dot_dimension_numbers<[1], [0], [0], [1], [0, 0, 1, 1], [], []>} : vector<16x4xf32>, vector<4x192xf32>, vector<16x192xf32> -> vector<16x192xf32>
    %c0_8 = arith.constant 0 : index
    %c0_9 = arith.constant 0 : index
    %6 = vector.load %arg4[%c0_8, %c0_9] : memref<1x192xf32, #tpu.memory_space<vmem>>, vector<1x192xf32>
    %7 = vector.broadcast %6 : vector<1x192xf32> to vector<16x192xf32>
    %8 = arith.addf %5, %7 : vector<16x192xf32>
    %9 = vector.shape_cast %8 : vector<16x192xf32> to vector<2x8x192xf32>
    %10 = vector.extract_strided_slice %9 {offsets = [0, 0, 0], sizes = [2, 8, 64], strides = [1, 1, 1]} : vector<2x8x192xf32> to vector<2x8x64xf32>
    %11 = vector.extract_strided_slice %9 {offsets = [0, 0, 64], sizes = [2, 8, 64], strides = [1, 1, 1]} : vector<2x8x192xf32> to vector<2x8x64xf32>
    %12 = vector.extract_strided_slice %9 {offsets = [0, 0, 128], sizes = [2, 8, 64], strides = [1, 1, 1]} : vector<2x8x192xf32> to vector<2x8x64xf32>
    %c0_10 = arith.constant 0 : index
    %c0_11 = arith.constant 0 : index
    %13 = vector.load %arg5[%c0_10, %c0_11] : memref<64x64xf32, #tpu.memory_space<vmem>>, vector<64x64xf32>
    %c0_12 = arith.constant 0 : index
    %c0_13 = arith.constant 0 : index
    %14 = vector.load %arg6[%c0_12, %c0_13] : memref<64x64xf32, #tpu.memory_space<vmem>>, vector<64x64xf32>
    %c0_14 = arith.constant 0 : index
    %c0_15 = arith.constant 0 : index
    %15 = vector.load %arg7[%c0_14, %c0_15] : memref<64x64xf32, #tpu.memory_space<vmem>>, vector<64x64xf32>
    %c0_16 = arith.constant 0 : index
    %c0_17 = arith.constant 0 : index
    %16 = vector.load %arg8[%c0_16, %c0_17] : memref<1x64xf32, #tpu.memory_space<vmem>>, vector<1x64xf32>
    %17 = tpu.iota {dimensions = array<i32: 1>} : vector<2x64xi32>
    %c32_i32 = arith.constant 32 : i32
    %18 = vector.broadcast %c32_i32 : i32 to vector<2x64xi32>
    %19 = arith.cmpi slt, %17, %18 : vector<2x64xi32>
    %cst_18 = arith.constant 0.000000e+00 : f32
    %20 = vector.broadcast %cst_18 : f32 to vector<2x64xf32>
    %21 = vector.extract_strided_slice %10 {offsets = [0, 0, 0], sizes = [2, 1, 64], strides = [1, 1, 1]} : vector<2x8x64xf32> to vector<2x1x64xf32>
    %22 = vector.shape_cast %21 : vector<2x1x64xf32> to vector<2x64xf32>
    %23 = vector.extract_strided_slice %10 {offsets = [0, 7, 0], sizes = [2, 1, 64], strides = [1, 1, 1]} : vector<2x8x64xf32> to vector<2x1x64xf32>
    %24 = vector.shape_cast %23 : vector<2x1x64xf32> to vector<2x64xf32>
    %25 = arith.select %19, %22, %24 : vector<2x64xi1>, vector<2x64xf32>
    %26 = vector.extract_strided_slice %11 {offsets = [0, 0, 0], sizes = [2, 1, 64], strides = [1, 1, 1]} : vector<2x8x64xf32> to vector<2x1x64xf32>
    %27 = vector.shape_cast %26 : vector<2x1x64xf32> to vector<2x64xf32>
    %28 = vector.extract_strided_slice %11 {offsets = [0, 7, 0], sizes = [2, 1, 64], strides = [1, 1, 1]} : vector<2x8x64xf32> to vector<2x1x64xf32>
    %29 = vector.shape_cast %28 : vector<2x1x64xf32> to vector<2x64xf32>
    %30 = arith.select %19, %27, %29 : vector<2x64xi1>, vector<2x64xf32>
    %31 = vector.extract_strided_slice %12 {offsets = [0, 0, 0], sizes = [2, 1, 64], strides = [1, 1, 1]} : vector<2x8x64xf32> to vector<2x1x64xf32>
    %32 = vector.shape_cast %31 : vector<2x1x64xf32> to vector<2x64xf32>
    %33 = vector.extract_strided_slice %12 {offsets = [0, 7, 0], sizes = [2, 1, 64], strides = [1, 1, 1]} : vector<2x8x64xf32> to vector<2x1x64xf32>
    %34 = vector.shape_cast %33 : vector<2x1x64xf32> to vector<2x64xf32>
    %35 = arith.select %19, %32, %34 : vector<2x64xi1>, vector<2x64xf32>
    %cst_19 = arith.constant dense<0.000000e+00> : vector<2x64xf32>
    %36 = tpu.matmul %20, %13, %cst_19 {dimension_numbers = #tpu.dot_dimension_numbers<[1], [0], [0], [1], [0, 0, 1, 1], [], []>} : vector<2x64xf32>, vector<64x64xf32>, vector<2x64xf32> -> vector<2x64xf32>
    %cst_20 = arith.constant dense<0.000000e+00> : vector<2x64xf32>
    %37 = tpu.matmul %20, %14, %cst_20 {dimension_numbers = #tpu.dot_dimension_numbers<[1], [0], [0], [1], [0, 0, 1, 1], [], []>} : vector<2x64xf32>, vector<64x64xf32>, vector<2x64xf32> -> vector<2x64xf32>
    %cst_21 = arith.constant dense<0.000000e+00> : vector<2x64xf32>
    %38 = tpu.matmul %20, %15, %cst_21 {dimension_numbers = #tpu.dot_dimension_numbers<[1], [0], [0], [1], [0, 0, 1, 1], [], []>} : vector<2x64xf32>, vector<64x64xf32>, vector<2x64xf32> -> vector<2x64xf32>
    %39 = vector.broadcast %16 : vector<1x64xf32> to vector<2x64xf32>
    %40 = arith.addf %38, %39 : vector<2x64xf32>
    %41 = arith.addf %25, %36 : vector<2x64xf32>
    %42 = arith.negf %41 : vector<2x64xf32>
    %43 = math.exp %42 : vector<2x64xf32>
    %cst_22 = arith.constant 1.000000e+00 : f32
    %44 = vector.broadcast %cst_22 : f32 to vector<2x64xf32>
    %45 = arith.addf %44, %43 : vector<2x64xf32>
    %46 = arith.divf %44, %45 : vector<2x64xf32>
    %47 = arith.addf %30, %37 : vector<2x64xf32>
    %48 = arith.negf %47 : vector<2x64xf32>
    %49 = math.exp %48 : vector<2x64xf32>
    %cst_23 = arith.constant 1.000000e+00 : f32
    %50 = vector.broadcast %cst_23 : f32 to vector<2x64xf32>
    %51 = arith.addf %50, %49 : vector<2x64xf32>
    %52 = arith.divf %50, %51 : vector<2x64xf32>
    %53 = arith.mulf %46, %40 : vector<2x64xf32>
    %54 = arith.addf %35, %53 : vector<2x64xf32>
    %55 = math.tanh %54 : vector<2x64xf32>
    %56 = arith.subf %20, %55 : vector<2x64xf32>
    %57 = arith.mulf %52, %56 : vector<2x64xf32>
    %58 = arith.addf %55, %57 : vector<2x64xf32>
    %59 = vector.extract_strided_slice %58 {offsets = [0, 0], sizes = [2, 32], strides = [1, 1]} : vector<2x64xf32> to vector<2x32xf32>
    %c0_24 = arith.constant 0 : index
    %c0_25 = arith.constant 0 : index
    %c0_26 = arith.constant 0 : index
    %60 = vector.load %arg12[%c0_24, %c0_25, %c0_26] : memref<2x8x128xf32, #tpu.memory_space<vmem>>, vector<2x1x32xf32>
    %61 = vector.shape_cast %60 : vector<2x1x32xf32> to vector<2x32xf32>
    %62 = vector.shape_cast %59 : vector<2x32xf32> to vector<2x1x32xf32>
    tpu.vector_store %arg12[%c0_24, %c0_25, %c0_26], %62 {strides = array<i32>} : memref<2x8x128xf32, #tpu.memory_space<vmem>>, vector<2x1x32xf32>,
    %63 = vector.extract_strided_slice %58 {offsets = [0, 32], sizes = [2, 32], strides = [1, 1]} : vector<2x64xf32> to vector<2x32xf32>
    %c0_27 = arith.constant 0 : index
    %c7 = arith.constant 7 : index
    %c32 = arith.constant 32 : index
    %64 = vector.load %arg12[%c0_27, %c7, %c32] : memref<2x8x128xf32, #tpu.memory_space<vmem>>, vector<2x1x32xf32>
    %65 = vector.shape_cast %64 : vector<2x1x32xf32> to vector<2x32xf32>
    %66 = vector.shape_cast %63 : vector<2x32xf32> to vector<2x1x32xf32>
    tpu.vector_store %arg12[%c0_27, %c7, %c32], %66 {strides = array<i32>} : memref<2x8x128xf32, #tpu.memory_space<vmem>>, vector<2x1x32xf32>,
    %67 = vector.extract_strided_slice %10 {offsets = [0, 1, 0], sizes = [2, 1, 64], strides = [1, 1, 1]} : vector<2x8x64xf32> to vector<2x1x64xf32>
    %68 = vector.shape_cast %67 : vector<2x1x64xf32> to vector<2x64xf32>
    %69 = vector.extract_strided_slice %10 {offsets = [0, 6, 0], sizes = [2, 1, 64], strides = [1, 1, 1]} : vector<2x8x64xf32> to vector<2x1x64xf32>
    %70 = vector.shape_cast %69 : vector<2x1x64xf32> to vector<2x64xf32>
    %71 = arith.select %19, %68, %70 : vector<2x64xi1>, vector<2x64xf32>
    %72 = vector.extract_strided_slice %11 {offsets = [0, 1, 0], sizes = [2, 1, 64], strides = [1, 1, 1]} : vector<2x8x64xf32> to vector<2x1x64xf32>
    %73 = vector.shape_cast %72 : vector<2x1x64xf32> to vector<2x64xf32>
    %74 = vector.extract_strided_slice %11 {offsets = [0, 6, 0], sizes = [2, 1, 64], strides = [1, 1, 1]} : vector<2x8x64xf32> to vector<2x1x64xf32>
    %75 = vector.shape_cast %74 : vector<2x1x64xf32> to vector<2x64xf32>
    %76 = arith.select %19, %73, %75 : vector<2x64xi1>, vector<2x64xf32>
    %77 = vector.extract_strided_slice %12 {offsets = [0, 1, 0], sizes = [2, 1, 64], strides = [1, 1, 1]} : vector<2x8x64xf32> to vector<2x1x64xf32>
    %78 = vector.shape_cast %77 : vector<2x1x64xf32> to vector<2x64xf32>
    %79 = vector.extract_strided_slice %12 {offsets = [0, 6, 0], sizes = [2, 1, 64], strides = [1, 1, 1]} : vector<2x8x64xf32> to vector<2x1x64xf32>
    %80 = vector.shape_cast %79 : vector<2x1x64xf32> to vector<2x64xf32>
    %81 = arith.select %19, %78, %80 : vector<2x64xi1>, vector<2x64xf32>
    %cst_28 = arith.constant dense<0.000000e+00> : vector<2x64xf32>
    %82 = tpu.matmul %58, %13, %cst_28 {dimension_numbers = #tpu.dot_dimension_numbers<[1], [0], [0], [1], [0, 0, 1, 1], [], []>} : vector<2x64xf32>, vector<64x64xf32>, vector<2x64xf32> -> vector<2x64xf32>
    %cst_29 = arith.constant dense<0.000000e+00> : vector<2x64xf32>
    %83 = tpu.matmul %58, %14, %cst_29 {dimension_numbers = #tpu.dot_dimension_numbers<[1], [0], [0], [1], [0, 0, 1, 1], [], []>} : vector<2x64xf32>, vector<64x64xf32>, vector<2x64xf32> -> vector<2x64xf32>
    %cst_30 = arith.constant dense<0.000000e+00> : vector<2x64xf32>
    %84 = tpu.matmul %58, %15, %cst_30 {dimension_numbers = #tpu.dot_dimension_numbers<[1], [0], [0], [1], [0, 0, 1, 1], [], []>} : vector<2x64xf32>, vector<64x64xf32>, vector<2x64xf32> -> vector<2x64xf32>
    %85 = vector.broadcast %16 : vector<1x64xf32> to vector<2x64xf32>
    %86 = arith.addf %84, %85 : vector<2x64xf32>
    %87 = arith.addf %71, %82 : vector<2x64xf32>
    %88 = arith.negf %87 : vector<2x64xf32>
    %89 = math.exp %88 : vector<2x64xf32>
    %cst_31 = arith.constant 1.000000e+00 : f32
    %90 = vector.broadcast %cst_31 : f32 to vector<2x64xf32>
    %91 = arith.addf %90, %89 : vector<2x64xf32>
    %92 = arith.divf %90, %91 : vector<2x64xf32>
    %93 = arith.addf %76, %83 : vector<2x64xf32>
    %94 = arith.negf %93 : vector<2x64xf32>
    %95 = math.exp %94 : vector<2x64xf32>
    %cst_32 = arith.constant 1.000000e+00 : f32
    %96 = vector.broadcast %cst_32 : f32 to vector<2x64xf32>
    %97 = arith.addf %96, %95 : vector<2x64xf32>
    %98 = arith.divf %96, %97 : vector<2x64xf32>
    %99 = arith.mulf %92, %86 : vector<2x64xf32>
    %100 = arith.addf %81, %99 : vector<2x64xf32>
    %101 = math.tanh %100 : vector<2x64xf32>
    %102 = arith.subf %58, %101 : vector<2x64xf32>
    %103 = arith.mulf %98, %102 : vector<2x64xf32>
    %104 = arith.addf %101, %103 : vector<2x64xf32>
    %105 = vector.extract_strided_slice %104 {offsets = [0, 0], sizes = [2, 32], strides = [1, 1]} : vector<2x64xf32> to vector<2x32xf32>
    %c0_33 = arith.constant 0 : index
    %c1 = arith.constant 1 : index
    %c0_34 = arith.constant 0 : index
    %106 = vector.load %arg12[%c0_33, %c1, %c0_34] : memref<2x8x128xf32, #tpu.memory_space<vmem>>, vector<2x1x32xf32>
    %107 = vector.shape_cast %106 : vector<2x1x32xf32> to vector<2x32xf32>
    %108 = vector.shape_cast %105 : vector<2x32xf32> to vector<2x1x32xf32>
    tpu.vector_store %arg12[%c0_33, %c1, %c0_34], %108 {strides = array<i32>} : memref<2x8x128xf32, #tpu.memory_space<vmem>>, vector<2x1x32xf32>,
    %109 = vector.extract_strided_slice %104 {offsets = [0, 32], sizes = [2, 32], strides = [1, 1]} : vector<2x64xf32> to vector<2x32xf32>
    %c0_35 = arith.constant 0 : index
    %c6 = arith.constant 6 : index
    %c32_36 = arith.constant 32 : index
    %110 = vector.load %arg12[%c0_35, %c6, %c32_36] : memref<2x8x128xf32, #tpu.memory_space<vmem>>, vector<2x1x32xf32>
    %111 = vector.shape_cast %110 : vector<2x1x32xf32> to vector<2x32xf32>
    %112 = vector.shape_cast %109 : vector<2x32xf32> to vector<2x1x32xf32>
    tpu.vector_store %arg12[%c0_35, %c6, %c32_36], %112 {strides = array<i32>} : memref<2x8x128xf32, #tpu.memory_space<vmem>>, vector<2x1x32xf32>,
    %113 = vector.extract_strided_slice %10 {offsets = [0, 2, 0], sizes = [2, 1, 64], strides = [1, 1, 1]} : vector<2x8x64xf32> to vector<2x1x64xf32>
    %114 = vector.shape_cast %113 : vector<2x1x64xf32> to vector<2x64xf32>
    %115 = vector.extract_strided_slice %10 {offsets = [0, 5, 0], sizes = [2, 1, 64], strides = [1, 1, 1]} : vector<2x8x64xf32> to vector<2x1x64xf32>
    %116 = vector.shape_cast %115 : vector<2x1x64xf32> to vector<2x64xf32>
    %117 = arith.select %19, %114, %116 : vector<2x64xi1>, vector<2x64xf32>
    %118 = vector.extract_strided_slice %11 {offsets = [0, 2, 0], sizes = [2, 1, 64], strides = [1, 1, 1]} : vector<2x8x64xf32> to vector<2x1x64xf32>
    %119 = vector.shape_cast %118 : vector<2x1x64xf32> to vector<2x64xf32>
    %120 = vector.extract_strided_slice %11 {offsets = [0, 5, 0], sizes = [2, 1, 64], strides = [1, 1, 1]} : vector<2x8x64xf32> to vector<2x1x64xf32>
    %121 = vector.shape_cast %120 : vector<2x1x64xf32> to vector<2x64xf32>
    %122 = arith.select %19, %119, %121 : vector<2x64xi1>, vector<2x64xf32>
    %123 = vector.extract_strided_slice %12 {offsets = [0, 2, 0], sizes = [2, 1, 64], strides = [1, 1, 1]} : vector<2x8x64xf32> to vector<2x1x64xf32>
    %124 = vector.shape_cast %123 : vector<2x1x64xf32> to vector<2x64xf32>
    %125 = vector.extract_strided_slice %12 {offsets = [0, 5, 0], sizes = [2, 1, 64], strides = [1, 1, 1]} : vector<2x8x64xf32> to vector<2x1x64xf32>
    %126 = vector.shape_cast %125 : vector<2x1x64xf32> to vector<2x64xf32>
    %127 = arith.select %19, %124, %126 : vector<2x64xi1>, vector<2x64xf32>
    %cst_37 = arith.constant dense<0.000000e+00> : vector<2x64xf32>
    %128 = tpu.matmul %104, %13, %cst_37 {dimension_numbers = #tpu.dot_dimension_numbers<[1], [0], [0], [1], [0, 0, 1, 1], [], []>} : vector<2x64xf32>, vector<64x64xf32>, vector<2x64xf32> -> vector<2x64xf32>
    %cst_38 = arith.constant dense<0.000000e+00> : vector<2x64xf32>
    %129 = tpu.matmul %104, %14, %cst_38 {dimension_numbers = #tpu.dot_dimension_numbers<[1], [0], [0], [1], [0, 0, 1, 1], [], []>} : vector<2x64xf32>, vector<64x64xf32>, vector<2x64xf32> -> vector<2x64xf32>
    %cst_39 = arith.constant dense<0.000000e+00> : vector<2x64xf32>
    %130 = tpu.matmul %104, %15, %cst_39 {dimension_numbers = #tpu.dot_dimension_numbers<[1], [0], [0], [1], [0, 0, 1, 1], [], []>} : vector<2x64xf32>, vector<64x64xf32>, vector<2x64xf32> -> vector<2x64xf32>
    %131 = vector.broadcast %16 : vector<1x64xf32> to vector<2x64xf32>
    %132 = arith.addf %130, %131 : vector<2x64xf32>
    %133 = arith.addf %117, %128 : vector<2x64xf32>
    %134 = arith.negf %133 : vector<2x64xf32>
    %135 = math.exp %134 : vector<2x64xf32>
    %cst_40 = arith.constant 1.000000e+00 : f32
    %136 = vector.broadcast %cst_40 : f32 to vector<2x64xf32>
    %137 = arith.addf %136, %135 : vector<2x64xf32>
    %138 = arith.divf %136, %137 : vector<2x64xf32>
    %139 = arith.addf %122, %129 : vector<2x64xf32>
    %140 = arith.negf %139 : vector<2x64xf32>
    %141 = math.exp %140 : vector<2x64xf32>
    %cst_41 = arith.constant 1.000000e+00 : f32
    %142 = vector.broadcast %cst_41 : f32 to vector<2x64xf32>
    %143 = arith.addf %142, %141 : vector<2x64xf32>
    %144 = arith.divf %142, %143 : vector<2x64xf32>
    %145 = arith.mulf %138, %132 : vector<2x64xf32>
    %146 = arith.addf %127, %145 : vector<2x64xf32>
    %147 = math.tanh %146 : vector<2x64xf32>
    %148 = arith.subf %104, %147 : vector<2x64xf32>
    %149 = arith.mulf %144, %148 : vector<2x64xf32>
    %150 = arith.addf %147, %149 : vector<2x64xf32>
    %151 = vector.extract_strided_slice %150 {offsets = [0, 0], sizes = [2, 32], strides = [1, 1]} : vector<2x64xf32> to vector<2x32xf32>
    %c0_42 = arith.constant 0 : index
    %c2 = arith.constant 2 : index
    %c0_43 = arith.constant 0 : index
    %152 = vector.load %arg12[%c0_42, %c2, %c0_43] : memref<2x8x128xf32, #tpu.memory_space<vmem>>, vector<2x1x32xf32>
    %153 = vector.shape_cast %152 : vector<2x1x32xf32> to vector<2x32xf32>
    %154 = vector.shape_cast %151 : vector<2x32xf32> to vector<2x1x32xf32>
    tpu.vector_store %arg12[%c0_42, %c2, %c0_43], %154 {strides = array<i32>} : memref<2x8x128xf32, #tpu.memory_space<vmem>>, vector<2x1x32xf32>,
    %155 = vector.extract_strided_slice %150 {offsets = [0, 32], sizes = [2, 32], strides = [1, 1]} : vector<2x64xf32> to vector<2x32xf32>
    %c0_44 = arith.constant 0 : index
    %c5 = arith.constant 5 : index
    %c32_45 = arith.constant 32 : index
    %156 = vector.load %arg12[%c0_44, %c5, %c32_45] : memref<2x8x128xf32, #tpu.memory_space<vmem>>, vector<2x1x32xf32>
    %157 = vector.shape_cast %156 : vector<2x1x32xf32> to vector<2x32xf32>
    %158 = vector.shape_cast %155 : vector<2x32xf32> to vector<2x1x32xf32>
    tpu.vector_store %arg12[%c0_44, %c5, %c32_45], %158 {strides = array<i32>} : memref<2x8x128xf32, #tpu.memory_space<vmem>>, vector<2x1x32xf32>,
    %159 = vector.extract_strided_slice %10 {offsets = [0, 3, 0], sizes = [2, 1, 64], strides = [1, 1, 1]} : vector<2x8x64xf32> to vector<2x1x64xf32>
    %160 = vector.shape_cast %159 : vector<2x1x64xf32> to vector<2x64xf32>
    %161 = vector.extract_strided_slice %10 {offsets = [0, 4, 0], sizes = [2, 1, 64], strides = [1, 1, 1]} : vector<2x8x64xf32> to vector<2x1x64xf32>
    %162 = vector.shape_cast %161 : vector<2x1x64xf32> to vector<2x64xf32>
    %163 = arith.select %19, %160, %162 : vector<2x64xi1>, vector<2x64xf32>
    %164 = vector.extract_strided_slice %11 {offsets = [0, 3, 0], sizes = [2, 1, 64], strides = [1, 1, 1]} : vector<2x8x64xf32> to vector<2x1x64xf32>
    %165 = vector.shape_cast %164 : vector<2x1x64xf32> to vector<2x64xf32>
    %166 = vector.extract_strided_slice %11 {offsets = [0, 4, 0], sizes = [2, 1, 64], strides = [1, 1, 1]} : vector<2x8x64xf32> to vector<2x1x64xf32>
    %167 = vector.shape_cast %166 : vector<2x1x64xf32> to vector<2x64xf32>
    %168 = arith.select %19, %165, %167 : vector<2x64xi1>, vector<2x64xf32>
    %169 = vector.extract_strided_slice %12 {offsets = [0, 3, 0], sizes = [2, 1, 64], strides = [1, 1, 1]} : vector<2x8x64xf32> to vector<2x1x64xf32>
    %170 = vector.shape_cast %169 : vector<2x1x64xf32> to vector<2x64xf32>
    %171 = vector.extract_strided_slice %12 {offsets = [0, 4, 0], sizes = [2, 1, 64], strides = [1, 1, 1]} : vector<2x8x64xf32> to vector<2x1x64xf32>
    %172 = vector.shape_cast %171 : vector<2x1x64xf32> to vector<2x64xf32>
    %173 = arith.select %19, %170, %172 : vector<2x64xi1>, vector<2x64xf32>
    %cst_46 = arith.constant dense<0.000000e+00> : vector<2x64xf32>
    %174 = tpu.matmul %150, %13, %cst_46 {dimension_numbers = #tpu.dot_dimension_numbers<[1], [0], [0], [1], [0, 0, 1, 1], [], []>} : vector<2x64xf32>, vector<64x64xf32>, vector<2x64xf32> -> vector<2x64xf32>
    %cst_47 = arith.constant dense<0.000000e+00> : vector<2x64xf32>
    %175 = tpu.matmul %150, %14, %cst_47 {dimension_numbers = #tpu.dot_dimension_numbers<[1], [0], [0], [1], [0, 0, 1, 1], [], []>} : vector<2x64xf32>, vector<64x64xf32>, vector<2x64xf32> -> vector<2x64xf32>
    %cst_48 = arith.constant dense<0.000000e+00> : vector<2x64xf32>
    %176 = tpu.matmul %150, %15, %cst_48 {dimension_numbers = #tpu.dot_dimension_numbers<[1], [0], [0], [1], [0, 0, 1, 1], [], []>} : vector<2x64xf32>, vector<64x64xf32>, vector<2x64xf32> -> vector<2x64xf32>
    %177 = vector.broadcast %16 : vector<1x64xf32> to vector<2x64xf32>
    %178 = arith.addf %176, %177 : vector<2x64xf32>
    %179 = arith.addf %163, %174 : vector<2x64xf32>
    %180 = arith.negf %179 : vector<2x64xf32>
    %181 = math.exp %180 : vector<2x64xf32>
    %cst_49 = arith.constant 1.000000e+00 : f32
    %182 = vector.broadcast %cst_49 : f32 to vector<2x64xf32>
    %183 = arith.addf %182, %181 : vector<2x64xf32>
    %184 = arith.divf %182, %183 : vector<2x64xf32>
    %185 = arith.addf %168, %175 : vector<2x64xf32>
    %186 = arith.negf %185 : vector<2x64xf32>
    %187 = math.exp %186 : vector<2x64xf32>
    %cst_50 = arith.constant 1.000000e+00 : f32
    %188 = vector.broadcast %cst_50 : f32 to vector<2x64xf32>
    %189 = arith.addf %188, %187 : vector<2x64xf32>
    %190 = arith.divf %188, %189 : vector<2x64xf32>
    %191 = arith.mulf %184, %178 : vector<2x64xf32>
    %192 = arith.addf %173, %191 : vector<2x64xf32>
    %193 = math.tanh %192 : vector<2x64xf32>
    %194 = arith.subf %150, %193 : vector<2x64xf32>
    %195 = arith.mulf %190, %194 : vector<2x64xf32>
    %196 = arith.addf %193, %195 : vector<2x64xf32>
    %197 = vector.extract_strided_slice %196 {offsets = [0, 0], sizes = [2, 32], strides = [1, 1]} : vector<2x64xf32> to vector<2x32xf32>
    %c0_51 = arith.constant 0 : index
    %c3 = arith.constant 3 : index
    %c0_52 = arith.constant 0 : index
    %198 = vector.load %arg12[%c0_51, %c3, %c0_52] : memref<2x8x128xf32, #tpu.memory_space<vmem>>, vector<2x1x32xf32>
    %199 = vector.shape_cast %198 : vector<2x1x32xf32> to vector<2x32xf32>
    %200 = vector.shape_cast %197 : vector<2x32xf32> to vector<2x1x32xf32>
    tpu.vector_store %arg12[%c0_51, %c3, %c0_52], %200 {strides = array<i32>} : memref<2x8x128xf32, #tpu.memory_space<vmem>>, vector<2x1x32xf32>,
    %201 = vector.extract_strided_slice %196 {offsets = [0, 32], sizes = [2, 32], strides = [1, 1]} : vector<2x64xf32> to vector<2x32xf32>
    %c0_53 = arith.constant 0 : index
    %c4 = arith.constant 4 : index
    %c32_54 = arith.constant 32 : index
    %202 = vector.load %arg12[%c0_53, %c4, %c32_54] : memref<2x8x128xf32, #tpu.memory_space<vmem>>, vector<2x1x32xf32>
    %203 = vector.shape_cast %202 : vector<2x1x32xf32> to vector<2x32xf32>
    %204 = vector.shape_cast %201 : vector<2x32xf32> to vector<2x1x32xf32>
    tpu.vector_store %arg12[%c0_53, %c4, %c32_54], %204 {strides = array<i32>} : memref<2x8x128xf32, #tpu.memory_space<vmem>>, vector<2x1x32xf32>,
    %205 = vector.extract_strided_slice %10 {offsets = [0, 4, 0], sizes = [2, 1, 64], strides = [1, 1, 1]} : vector<2x8x64xf32> to vector<2x1x64xf32>
    %206 = vector.shape_cast %205 : vector<2x1x64xf32> to vector<2x64xf32>
    %207 = vector.extract_strided_slice %10 {offsets = [0, 3, 0], sizes = [2, 1, 64], strides = [1, 1, 1]} : vector<2x8x64xf32> to vector<2x1x64xf32>
    %208 = vector.shape_cast %207 : vector<2x1x64xf32> to vector<2x64xf32>
    %209 = arith.select %19, %206, %208 : vector<2x64xi1>, vector<2x64xf32>
    %210 = vector.extract_strided_slice %11 {offsets = [0, 4, 0], sizes = [2, 1, 64], strides = [1, 1, 1]} : vector<2x8x64xf32> to vector<2x1x64xf32>
    %211 = vector.shape_cast %210 : vector<2x1x64xf32> to vector<2x64xf32>
    %212 = vector.extract_strided_slice %11 {offsets = [0, 3, 0], sizes = [2, 1, 64], strides = [1, 1, 1]} : vector<2x8x64xf32> to vector<2x1x64xf32>
    %213 = vector.shape_cast %212 : vector<2x1x64xf32> to vector<2x64xf32>
    %214 = arith.select %19, %211, %213 : vector<2x64xi1>, vector<2x64xf32>
    %215 = vector.extract_strided_slice %12 {offsets = [0, 4, 0], sizes = [2, 1, 64], strides = [1, 1, 1]} : vector<2x8x64xf32> to vector<2x1x64xf32>
    %216 = vector.shape_cast %215 : vector<2x1x64xf32> to vector<2x64xf32>
    %217 = vector.extract_strided_slice %12 {offsets = [0, 3, 0], sizes = [2, 1, 64], strides = [1, 1, 1]} : vector<2x8x64xf32> to vector<2x1x64xf32>
    %218 = vector.shape_cast %217 : vector<2x1x64xf32> to vector<2x64xf32>
    %219 = arith.select %19, %216, %218 : vector<2x64xi1>, vector<2x64xf32>
    %cst_55 = arith.constant dense<0.000000e+00> : vector<2x64xf32>
    %220 = tpu.matmul %196, %13, %cst_55 {dimension_numbers = #tpu.dot_dimension_numbers<[1], [0], [0], [1], [0, 0, 1, 1], [], []>} : vector<2x64xf32>, vector<64x64xf32>, vector<2x64xf32> -> vector<2x64xf32>
    %cst_56 = arith.constant dense<0.000000e+00> : vector<2x64xf32>
    %221 = tpu.matmul %196, %14, %cst_56 {dimension_numbers = #tpu.dot_dimension_numbers<[1], [0], [0], [1], [0, 0, 1, 1], [], []>} : vector<2x64xf32>, vector<64x64xf32>, vector<2x64xf32> -> vector<2x64xf32>
    %cst_57 = arith.constant dense<0.000000e+00> : vector<2x64xf32>
    %222 = tpu.matmul %196, %15, %cst_57 {dimension_numbers = #tpu.dot_dimension_numbers<[1], [0], [0], [1], [0, 0, 1, 1], [], []>} : vector<2x64xf32>, vector<64x64xf32>, vector<2x64xf32> -> vector<2x64xf32>
    %223 = vector.broadcast %16 : vector<1x64xf32> to vector<2x64xf32>
    %224 = arith.addf %222, %223 : vector<2x64xf32>
    %225 = arith.addf %209, %220 : vector<2x64xf32>
    %226 = arith.negf %225 : vector<2x64xf32>
    %227 = math.exp %226 : vector<2x64xf32>
    %cst_58 = arith.constant 1.000000e+00 : f32
    %228 = vector.broadcast %cst_58 : f32 to vector<2x64xf32>
    %229 = arith.addf %228, %227 : vector<2x64xf32>
    %230 = arith.divf %228, %229 : vector<2x64xf32>
    %231 = arith.addf %214, %221 : vector<2x64xf32>
    %232 = arith.negf %231 : vector<2x64xf32>
    %233 = math.exp %232 : vector<2x64xf32>
    %cst_59 = arith.constant 1.000000e+00 : f32
    %234 = vector.broadcast %cst_59 : f32 to vector<2x64xf32>
    %235 = arith.addf %234, %233 : vector<2x64xf32>
    %236 = arith.divf %234, %235 : vector<2x64xf32>
    %237 = arith.mulf %230, %224 : vector<2x64xf32>
    %238 = arith.addf %219, %237 : vector<2x64xf32>
    %239 = math.tanh %238 : vector<2x64xf32>
    %240 = arith.subf %196, %239 : vector<2x64xf32>
    %241 = arith.mulf %236, %240 : vector<2x64xf32>
    %242 = arith.addf %239, %241 : vector<2x64xf32>
    %243 = vector.extract_strided_slice %242 {offsets = [0, 0], sizes = [2, 32], strides = [1, 1]} : vector<2x64xf32> to vector<2x32xf32>
    %c0_60 = arith.constant 0 : index
    %c4_61 = arith.constant 4 : index
    %c0_62 = arith.constant 0 : index
    %244 = vector.load %arg12[%c0_60, %c4_61, %c0_62] : memref<2x8x128xf32, #tpu.memory_space<vmem>>, vector<2x1x32xf32>
    %245 = vector.shape_cast %244 : vector<2x1x32xf32> to vector<2x32xf32>
    %246 = vector.shape_cast %243 : vector<2x32xf32> to vector<2x1x32xf32>
    tpu.vector_store %arg12[%c0_60, %c4_61, %c0_62], %246 {strides = array<i32>} : memref<2x8x128xf32, #tpu.memory_space<vmem>>, vector<2x1x32xf32>,
    %247 = vector.extract_strided_slice %242 {offsets = [0, 32], sizes = [2, 32], strides = [1, 1]} : vector<2x64xf32> to vector<2x32xf32>
    %c0_63 = arith.constant 0 : index
    %c3_64 = arith.constant 3 : index
    %c32_65 = arith.constant 32 : index
    %248 = vector.load %arg12[%c0_63, %c3_64, %c32_65] : memref<2x8x128xf32, #tpu.memory_space<vmem>>, vector<2x1x32xf32>
    %249 = vector.shape_cast %248 : vector<2x1x32xf32> to vector<2x32xf32>
    %250 = vector.shape_cast %247 : vector<2x32xf32> to vector<2x1x32xf32>
    tpu.vector_store %arg12[%c0_63, %c3_64, %c32_65], %250 {strides = array<i32>} : memref<2x8x128xf32, #tpu.memory_space<vmem>>, vector<2x1x32xf32>,
    %251 = vector.extract_strided_slice %10 {offsets = [0, 5, 0], sizes = [2, 1, 64], strides = [1, 1, 1]} : vector<2x8x64xf32> to vector<2x1x64xf32>
    %252 = vector.shape_cast %251 : vector<2x1x64xf32> to vector<2x64xf32>
    %253 = vector.extract_strided_slice %10 {offsets = [0, 2, 0], sizes = [2, 1, 64], strides = [1, 1, 1]} : vector<2x8x64xf32> to vector<2x1x64xf32>
    %254 = vector.shape_cast %253 : vector<2x1x64xf32> to vector<2x64xf32>
    %255 = arith.select %19, %252, %254 : vector<2x64xi1>, vector<2x64xf32>
    %256 = vector.extract_strided_slice %11 {offsets = [0, 5, 0], sizes = [2, 1, 64], strides = [1, 1, 1]} : vector<2x8x64xf32> to vector<2x1x64xf32>
    %257 = vector.shape_cast %256 : vector<2x1x64xf32> to vector<2x64xf32>
    %258 = vector.extract_strided_slice %11 {offsets = [0, 2, 0], sizes = [2, 1, 64], strides = [1, 1, 1]} : vector<2x8x64xf32> to vector<2x1x64xf32>
    %259 = vector.shape_cast %258 : vector<2x1x64xf32> to vector<2x64xf32>
    %260 = arith.select %19, %257, %259 : vector<2x64xi1>, vector<2x64xf32>
    %261 = vector.extract_strided_slice %12 {offsets = [0, 5, 0], sizes = [2, 1, 64], strides = [1, 1, 1]} : vector<2x8x64xf32> to vector<2x1x64xf32>
    %262 = vector.shape_cast %261 : vector<2x1x64xf32> to vector<2x64xf32>
    %263 = vector.extract_strided_slice %12 {offsets = [0, 2, 0], sizes = [2, 1, 64], strides = [1, 1, 1]} : vector<2x8x64xf32> to vector<2x1x64xf32>
    %264 = vector.shape_cast %263 : vector<2x1x64xf32> to vector<2x64xf32>
    %265 = arith.select %19, %262, %264 : vector<2x64xi1>, vector<2x64xf32>
    %cst_66 = arith.constant dense<0.000000e+00> : vector<2x64xf32>
    %266 = tpu.matmul %242, %13, %cst_66 {dimension_numbers = #tpu.dot_dimension_numbers<[1], [0], [0], [1], [0, 0, 1, 1], [], []>} : vector<2x64xf32>, vector<64x64xf32>, vector<2x64xf32> -> vector<2x64xf32>
    %cst_67 = arith.constant dense<0.000000e+00> : vector<2x64xf32>
    %267 = tpu.matmul %242, %14, %cst_67 {dimension_numbers = #tpu.dot_dimension_numbers<[1], [0], [0], [1], [0, 0, 1, 1], [], []>} : vector<2x64xf32>, vector<64x64xf32>, vector<2x64xf32> -> vector<2x64xf32>
    %cst_68 = arith.constant dense<0.000000e+00> : vector<2x64xf32>
    %268 = tpu.matmul %242, %15, %cst_68 {dimension_numbers = #tpu.dot_dimension_numbers<[1], [0], [0], [1], [0, 0, 1, 1], [], []>} : vector<2x64xf32>, vector<64x64xf32>, vector<2x64xf32> -> vector<2x64xf32>
    %269 = vector.broadcast %16 : vector<1x64xf32> to vector<2x64xf32>
    %270 = arith.addf %268, %269 : vector<2x64xf32>
    %271 = arith.addf %255, %266 : vector<2x64xf32>
    %272 = arith.negf %271 : vector<2x64xf32>
    %273 = math.exp %272 : vector<2x64xf32>
    %cst_69 = arith.constant 1.000000e+00 : f32
    %274 = vector.broadcast %cst_69 : f32 to vector<2x64xf32>
    %275 = arith.addf %274, %273 : vector<2x64xf32>
    %276 = arith.divf %274, %275 : vector<2x64xf32>
    %277 = arith.addf %260, %267 : vector<2x64xf32>
    %278 = arith.negf %277 : vector<2x64xf32>
    %279 = math.exp %278 : vector<2x64xf32>
    %cst_70 = arith.constant 1.000000e+00 : f32
    %280 = vector.broadcast %cst_70 : f32 to vector<2x64xf32>
    %281 = arith.addf %280, %279 : vector<2x64xf32>
    %282 = arith.divf %280, %281 : vector<2x64xf32>
    %283 = arith.mulf %276, %270 : vector<2x64xf32>
    %284 = arith.addf %265, %283 : vector<2x64xf32>
    %285 = math.tanh %284 : vector<2x64xf32>
    %286 = arith.subf %242, %285 : vector<2x64xf32>
    %287 = arith.mulf %282, %286 : vector<2x64xf32>
    %288 = arith.addf %285, %287 : vector<2x64xf32>
    %289 = vector.extract_strided_slice %288 {offsets = [0, 0], sizes = [2, 32], strides = [1, 1]} : vector<2x64xf32> to vector<2x32xf32>
    %c0_71 = arith.constant 0 : index
    %c5_72 = arith.constant 5 : index
    %c0_73 = arith.constant 0 : index
    %290 = vector.load %arg12[%c0_71, %c5_72, %c0_73] : memref<2x8x128xf32, #tpu.memory_space<vmem>>, vector<2x1x32xf32>
    %291 = vector.shape_cast %290 : vector<2x1x32xf32> to vector<2x32xf32>
    %292 = vector.shape_cast %289 : vector<2x32xf32> to vector<2x1x32xf32>
    tpu.vector_store %arg12[%c0_71, %c5_72, %c0_73], %292 {strides = array<i32>} : memref<2x8x128xf32, #tpu.memory_space<vmem>>, vector<2x1x32xf32>,
    %293 = vector.extract_strided_slice %288 {offsets = [0, 32], sizes = [2, 32], strides = [1, 1]} : vector<2x64xf32> to vector<2x32xf32>
    %c0_74 = arith.constant 0 : index
    %c2_75 = arith.constant 2 : index
    %c32_76 = arith.constant 32 : index
    %294 = vector.load %arg12[%c0_74, %c2_75, %c32_76] : memref<2x8x128xf32, #tpu.memory_space<vmem>>, vector<2x1x32xf32>
    %295 = vector.shape_cast %294 : vector<2x1x32xf32> to vector<2x32xf32>
    %296 = vector.shape_cast %293 : vector<2x32xf32> to vector<2x1x32xf32>
    tpu.vector_store %arg12[%c0_74, %c2_75, %c32_76], %296 {strides = array<i32>} : memref<2x8x128xf32, #tpu.memory_space<vmem>>, vector<2x1x32xf32>,
    %297 = vector.extract_strided_slice %10 {offsets = [0, 6, 0], sizes = [2, 1, 64], strides = [1, 1, 1]} : vector<2x8x64xf32> to vector<2x1x64xf32>
    %298 = vector.shape_cast %297 : vector<2x1x64xf32> to vector<2x64xf32>
    %299 = vector.extract_strided_slice %10 {offsets = [0, 1, 0], sizes = [2, 1, 64], strides = [1, 1, 1]} : vector<2x8x64xf32> to vector<2x1x64xf32>
    %300 = vector.shape_cast %299 : vector<2x1x64xf32> to vector<2x64xf32>
    %301 = arith.select %19, %298, %300 : vector<2x64xi1>, vector<2x64xf32>
    %302 = vector.extract_strided_slice %11 {offsets = [0, 6, 0], sizes = [2, 1, 64], strides = [1, 1, 1]} : vector<2x8x64xf32> to vector<2x1x64xf32>
    %303 = vector.shape_cast %302 : vector<2x1x64xf32> to vector<2x64xf32>
    %304 = vector.extract_strided_slice %11 {offsets = [0, 1, 0], sizes = [2, 1, 64], strides = [1, 1, 1]} : vector<2x8x64xf32> to vector<2x1x64xf32>
    %305 = vector.shape_cast %304 : vector<2x1x64xf32> to vector<2x64xf32>
    %306 = arith.select %19, %303, %305 : vector<2x64xi1>, vector<2x64xf32>
    %307 = vector.extract_strided_slice %12 {offsets = [0, 6, 0], sizes = [2, 1, 64], strides = [1, 1, 1]} : vector<2x8x64xf32> to vector<2x1x64xf32>
    %308 = vector.shape_cast %307 : vector<2x1x64xf32> to vector<2x64xf32>
    %309 = vector.extract_strided_slice %12 {offsets = [0, 1, 0], sizes = [2, 1, 64], strides = [1, 1, 1]} : vector<2x8x64xf32> to vector<2x1x64xf32>
    %310 = vector.shape_cast %309 : vector<2x1x64xf32> to vector<2x64xf32>
    %311 = arith.select %19, %308, %310 : vector<2x64xi1>, vector<2x64xf32>
    %cst_77 = arith.constant dense<0.000000e+00> : vector<2x64xf32>
    %312 = tpu.matmul %288, %13, %cst_77 {dimension_numbers = #tpu.dot_dimension_numbers<[1], [0], [0], [1], [0, 0, 1, 1], [], []>} : vector<2x64xf32>, vector<64x64xf32>, vector<2x64xf32> -> vector<2x64xf32>
    %cst_78 = arith.constant dense<0.000000e+00> : vector<2x64xf32>
    %313 = tpu.matmul %288, %14, %cst_78 {dimension_numbers = #tpu.dot_dimension_numbers<[1], [0], [0], [1], [0, 0, 1, 1], [], []>} : vector<2x64xf32>, vector<64x64xf32>, vector<2x64xf32> -> vector<2x64xf32>
    %cst_79 = arith.constant dense<0.000000e+00> : vector<2x64xf32>
    %314 = tpu.matmul %288, %15, %cst_79 {dimension_numbers = #tpu.dot_dimension_numbers<[1], [0], [0], [1], [0, 0, 1, 1], [], []>} : vector<2x64xf32>, vector<64x64xf32>, vector<2x64xf32> -> vector<2x64xf32>
    %315 = vector.broadcast %16 : vector<1x64xf32> to vector<2x64xf32>
    %316 = arith.addf %314, %315 : vector<2x64xf32>
    %317 = arith.addf %301, %312 : vector<2x64xf32>
    %318 = arith.negf %317 : vector<2x64xf32>
    %319 = math.exp %318 : vector<2x64xf32>
    %cst_80 = arith.constant 1.000000e+00 : f32
    %320 = vector.broadcast %cst_80 : f32 to vector<2x64xf32>
    %321 = arith.addf %320, %319 : vector<2x64xf32>
    %322 = arith.divf %320, %321 : vector<2x64xf32>
    %323 = arith.addf %306, %313 : vector<2x64xf32>
    %324 = arith.negf %323 : vector<2x64xf32>
    %325 = math.exp %324 : vector<2x64xf32>
    %cst_81 = arith.constant 1.000000e+00 : f32
    %326 = vector.broadcast %cst_81 : f32 to vector<2x64xf32>
    %327 = arith.addf %326, %325 : vector<2x64xf32>
    %328 = arith.divf %326, %327 : vector<2x64xf32>
    %329 = arith.mulf %322, %316 : vector<2x64xf32>
    %330 = arith.addf %311, %329 : vector<2x64xf32>
    %331 = math.tanh %330 : vector<2x64xf32>
    %332 = arith.subf %288, %331 : vector<2x64xf32>
    %333 = arith.mulf %328, %332 : vector<2x64xf32>
    %334 = arith.addf %331, %333 : vector<2x64xf32>
    %335 = vector.extract_strided_slice %334 {offsets = [0, 0], sizes = [2, 32], strides = [1, 1]} : vector<2x64xf32> to vector<2x32xf32>
    %c0_82 = arith.constant 0 : index
    %c6_83 = arith.constant 6 : index
    %c0_84 = arith.constant 0 : index
    %336 = vector.load %arg12[%c0_82, %c6_83, %c0_84] : memref<2x8x128xf32, #tpu.memory_space<vmem>>, vector<2x1x32xf32>
    %337 = vector.shape_cast %336 : vector<2x1x32xf32> to vector<2x32xf32>
    %338 = vector.shape_cast %335 : vector<2x32xf32> to vector<2x1x32xf32>
    tpu.vector_store %arg12[%c0_82, %c6_83, %c0_84], %338 {strides = array<i32>} : memref<2x8x128xf32, #tpu.memory_space<vmem>>, vector<2x1x32xf32>,
    %339 = vector.extract_strided_slice %334 {offsets = [0, 32], sizes = [2, 32], strides = [1, 1]} : vector<2x64xf32> to vector<2x32xf32>
    %c0_85 = arith.constant 0 : index
    %c1_86 = arith.constant 1 : index
    %c32_87 = arith.constant 32 : index
    %340 = vector.load %arg12[%c0_85, %c1_86, %c32_87] : memref<2x8x128xf32, #tpu.memory_space<vmem>>, vector<2x1x32xf32>
    %341 = vector.shape_cast %340 : vector<2x1x32xf32> to vector<2x32xf32>
    %342 = vector.shape_cast %339 : vector<2x32xf32> to vector<2x1x32xf32>
    tpu.vector_store %arg12[%c0_85, %c1_86, %c32_87], %342 {strides = array<i32>} : memref<2x8x128xf32, #tpu.memory_space<vmem>>, vector<2x1x32xf32>,
    %343 = vector.extract_strided_slice %10 {offsets = [0, 7, 0], sizes = [2, 1, 64], strides = [1, 1, 1]} : vector<2x8x64xf32> to vector<2x1x64xf32>
    %344 = vector.shape_cast %343 : vector<2x1x64xf32> to vector<2x64xf32>
    %345 = vector.extract_strided_slice %10 {offsets = [0, 0, 0], sizes = [2, 1, 64], strides = [1, 1, 1]} : vector<2x8x64xf32> to vector<2x1x64xf32>
    %346 = vector.shape_cast %345 : vector<2x1x64xf32> to vector<2x64xf32>
    %347 = arith.select %19, %344, %346 : vector<2x64xi1>, vector<2x64xf32>
    %348 = vector.extract_strided_slice %11 {offsets = [0, 7, 0], sizes = [2, 1, 64], strides = [1, 1, 1]} : vector<2x8x64xf32> to vector<2x1x64xf32>
    %349 = vector.shape_cast %348 : vector<2x1x64xf32> to vector<2x64xf32>
    %350 = vector.extract_strided_slice %11 {offsets = [0, 0, 0], sizes = [2, 1, 64], strides = [1, 1, 1]} : vector<2x8x64xf32> to vector<2x1x64xf32>
    %351 = vector.shape_cast %350 : vector<2x1x64xf32> to vector<2x64xf32>
    %352 = arith.select %19, %349, %351 : vector<2x64xi1>, vector<2x64xf32>
    %353 = vector.extract_strided_slice %12 {offsets = [0, 7, 0], sizes = [2, 1, 64], strides = [1, 1, 1]} : vector<2x8x64xf32> to vector<2x1x64xf32>
    %354 = vector.shape_cast %353 : vector<2x1x64xf32> to vector<2x64xf32>
    %355 = vector.extract_strided_slice %12 {offsets = [0, 0, 0], sizes = [2, 1, 64], strides = [1, 1, 1]} : vector<2x8x64xf32> to vector<2x1x64xf32>
    %356 = vector.shape_cast %355 : vector<2x1x64xf32> to vector<2x64xf32>
    %357 = arith.select %19, %354, %356 : vector<2x64xi1>, vector<2x64xf32>
    %cst_88 = arith.constant dense<0.000000e+00> : vector<2x64xf32>
    %358 = tpu.matmul %334, %13, %cst_88 {dimension_numbers = #tpu.dot_dimension_numbers<[1], [0], [0], [1], [0, 0, 1, 1], [], []>} : vector<2x64xf32>, vector<64x64xf32>, vector<2x64xf32> -> vector<2x64xf32>
    %cst_89 = arith.constant dense<0.000000e+00> : vector<2x64xf32>
    %359 = tpu.matmul %334, %14, %cst_89 {dimension_numbers = #tpu.dot_dimension_numbers<[1], [0], [0], [1], [0, 0, 1, 1], [], []>} : vector<2x64xf32>, vector<64x64xf32>, vector<2x64xf32> -> vector<2x64xf32>
    %cst_90 = arith.constant dense<0.000000e+00> : vector<2x64xf32>
    %360 = tpu.matmul %334, %15, %cst_90 {dimension_numbers = #tpu.dot_dimension_numbers<[1], [0], [0], [1], [0, 0, 1, 1], [], []>} : vector<2x64xf32>, vector<64x64xf32>, vector<2x64xf32> -> vector<2x64xf32>
    %361 = vector.broadcast %16 : vector<1x64xf32> to vector<2x64xf32>
    %362 = arith.addf %360, %361 : vector<2x64xf32>
    %363 = arith.addf %347, %358 : vector<2x64xf32>
    %364 = arith.negf %363 : vector<2x64xf32>
    %365 = math.exp %364 : vector<2x64xf32>
    %cst_91 = arith.constant 1.000000e+00 : f32
    %366 = vector.broadcast %cst_91 : f32 to vector<2x64xf32>
    %367 = arith.addf %366, %365 : vector<2x64xf32>
    %368 = arith.divf %366, %367 : vector<2x64xf32>
    %369 = arith.addf %352, %359 : vector<2x64xf32>
    %370 = arith.negf %369 : vector<2x64xf32>
    %371 = math.exp %370 : vector<2x64xf32>
    %cst_92 = arith.constant 1.000000e+00 : f32
    %372 = vector.broadcast %cst_92 : f32 to vector<2x64xf32>
    %373 = arith.addf %372, %371 : vector<2x64xf32>
    %374 = arith.divf %372, %373 : vector<2x64xf32>
    %375 = arith.mulf %368, %362 : vector<2x64xf32>
    %376 = arith.addf %357, %375 : vector<2x64xf32>
    %377 = math.tanh %376 : vector<2x64xf32>
    %378 = arith.subf %334, %377 : vector<2x64xf32>
    %379 = arith.mulf %374, %378 : vector<2x64xf32>
    %380 = arith.addf %377, %379 : vector<2x64xf32>
    %381 = vector.extract_strided_slice %380 {offsets = [0, 0], sizes = [2, 32], strides = [1, 1]} : vector<2x64xf32> to vector<2x32xf32>
    %c0_93 = arith.constant 0 : index
    %c7_94 = arith.constant 7 : index
    %c0_95 = arith.constant 0 : index
    %382 = vector.load %arg12[%c0_93, %c7_94, %c0_95] : memref<2x8x128xf32, #tpu.memory_space<vmem>>, vector<2x1x32xf32>
    %383 = vector.shape_cast %382 : vector<2x1x32xf32> to vector<2x32xf32>
    %384 = vector.shape_cast %381 : vector<2x32xf32> to vector<2x1x32xf32>
    tpu.vector_store %arg12[%c0_93, %c7_94, %c0_95], %384 {strides = array<i32>} : memref<2x8x128xf32, #tpu.memory_space<vmem>>, vector<2x1x32xf32>,
    %385 = vector.extract_strided_slice %380 {offsets = [0, 32], sizes = [2, 32], strides = [1, 1]} : vector<2x64xf32> to vector<2x32xf32>
    %c0_96 = arith.constant 0 : index
    %c0_97 = arith.constant 0 : index
    %c32_98 = arith.constant 32 : index
    %386 = vector.load %arg12[%c0_96, %c0_97, %c32_98] : memref<2x8x128xf32, #tpu.memory_space<vmem>>, vector<2x1x32xf32>
    %387 = vector.shape_cast %386 : vector<2x1x32xf32> to vector<2x32xf32>
    %388 = vector.shape_cast %385 : vector<2x32xf32> to vector<2x1x32xf32>
    tpu.vector_store %arg12[%c0_96, %c0_97, %c32_98], %388 {strides = array<i32>} : memref<2x8x128xf32, #tpu.memory_space<vmem>>, vector<2x1x32xf32>,
    %c0_99 = arith.constant 0 : index
    %c0_100 = arith.constant 0 : index
    %c0_101 = arith.constant 0 : index
    %389 = vector.load %arg12[%c0_99, %c0_100, %c0_101] : memref<2x8x128xf32, #tpu.memory_space<vmem>>, vector<2x8x128xf32>
    %390 = vector.shape_cast %389 : vector<2x8x128xf32> to vector<16x128xf32>
    %c0_102 = arith.constant 0 : index
    %c0_103 = arith.constant 0 : index
    %391 = vector.load %arg9[%c0_102, %c0_103] : memref<128x128xf32, #tpu.memory_space<vmem>>, vector<128x128xf32>
    %cst_104 = arith.constant dense<0.000000e+00> : vector<16x128xf32>
    %392 = tpu.matmul %390, %391, %cst_104 {dimension_numbers = #tpu.dot_dimension_numbers<[1], [0], [0], [1], [0, 0, 1, 1], [], []>} : vector<16x128xf32>, vector<128x128xf32>, vector<16x128xf32> -> vector<16x128xf32>
    %c0_105 = arith.constant 0 : index
    %c0_106 = arith.constant 0 : index
    %393 = vector.load %arg10[%c0_105, %c0_106] : memref<1x128xf32, #tpu.memory_space<vmem>>, vector<1x128xf32>
    %394 = vector.broadcast %393 : vector<1x128xf32> to vector<16x128xf32>
    %395 = arith.addf %392, %394 : vector<16x128xf32>
    %396 = vector.shape_cast %395 : vector<16x128xf32> to vector<2x8x128xf32>
    %c0_107 = arith.constant 0 : index
    %c0_108 = arith.constant 0 : index
    %c0_109 = arith.constant 0 : index
    %397 = vector.load %arg2[%c0_107, %c0_108, %c0_109] : memref<2x8x128xf32, #tpu.memory_space<vmem>>, vector<2x8x128xf32>
    %cst_110 = arith.constant 0.000000e+00 : f32
    %398 = vector.broadcast %cst_110 : f32 to vector<2x8x128xf32>
    %399 = arith.cmpf oeq, %397, %398 : vector<2x8x128xf32>
    %cst_111 = arith.constant 0xCB18967F : f32
    %400 = vector.broadcast %cst_111 : f32 to vector<2x8x128xf32>
    %401 = arith.select %399, %400, %396 : vector<2x8x128xi1>, vector<2x8x128xf32>
    %cst_112 = arith.constant dense<0xFF800000> : vector<2x8xf32>
    %402 = vector.multi_reduction <maximumf>, %401, %cst_112 [2] : vector<2x8x128xf32> to vector<2x8xf32>
    %403 = vector.shape_cast %402 : vector<2x8xf32> to vector<2x8x1xf32>
    %404 = vector.broadcast %403 : vector<2x8x1xf32> to vector<2x8x128xf32>
    %405 = arith.subf %401, %404 : vector<2x8x128xf32>
    %406 = math.exp %405 : vector<2x8x128xf32>
    %cst_113 = arith.constant dense<0.000000e+00> : vector<2x8xf32>
    %407 = vector.multi_reduction <add>, %406, %cst_113 [2] : vector<2x8x128xf32> to vector<2x8xf32>
    %408 = vector.shape_cast %407 : vector<2x8xf32> to vector<2x8x1xf32>
    %409 = tpu.reciprocal %408 {approx = true} : vector<2x8x1xf32> -> vector<2x8x1xf32>
    %410 = arith.mulf %408, %409 : vector<2x8x1xf32>
    %cst_114 = arith.constant 2.000000e+00 : f32
    %411 = vector.broadcast %cst_114 : f32 to vector<2x8x1xf32>
    %412 = arith.subf %411, %410 : vector<2x8x1xf32>
    %413 = arith.mulf %409, %412 : vector<2x8x1xf32>
    %414 = vector.broadcast %413 : vector<2x8x1xf32> to vector<2x8x128xf32>
    %415 = arith.mulf %406, %414 : vector<2x8x128xf32>
    %416 = vector.extract_strided_slice %415 {offsets = [0, 0, 0], sizes = [2, 8, 8], strides = [1, 1, 1]} : vector<2x8x128xf32> to vector<2x8x8xf32>
    "tpu.trace_start"() <{level = 10 : i32, message = "bij,bjd->bid"}> : () -> ()
    %cst_115 = arith.constant dense<0.000000e+00> : vector<2x8x128xf32>
    %417 = tpu.matmul %416, %389, %cst_115 {dimension_numbers = #tpu.dot_dimension_numbers<[2], [1], [1], [2], [0, 0, 0, 1, 1, 2], [0], [0]>} : vector<2x8x8xf32>, vector<2x8x128xf32>, vector<2x8x128xf32> -> vector<2x8x128xf32>
    "tpu.trace_stop"() : () -> ()
    %c0_116 = arith.constant 0 : index
    %c0_117 = arith.constant 0 : index
    %c0_118 = arith.constant 0 : index
    %418 = vector.load %arg11[%c0_116, %c0_117, %c0_118] : memref<2x8x128xf32, #tpu.memory_space<vmem>>, vector<2x8x128xf32>
    tpu.vector_store %arg11[%c0_116, %c0_117, %c0_118], %417 {strides = array<i32>} : memref<2x8x128xf32, #tpu.memory_space<vmem>>, vector<2x8x128xf32>,
    return
  }
  func.func @transform_0(%arg0: i32) -> (i32, i32, i32) {
    %c0_i32 = arith.constant 0 : i32
    %c0_i32_0 = arith.constant 0 : i32
    %c0_i32_1 = arith.constant 0 : i32
    return %arg0, %c0_i32, %c0_i32_0 : i32, i32, i32
  }
  func.func @transform_1(%arg0: i32) -> (i32, i32, i32) {
    %c0_i32 = arith.constant 0 : i32
    %c0_i32_0 = arith.constant 0 : i32
    %c0_i32_1 = arith.constant 0 : i32
    return %arg0, %c0_i32, %c0_i32_0 : i32, i32, i32
  }
  func.func @transform_2(%arg0: i32) -> (i32, i32) {
    %c0_i32 = arith.constant 0 : i32
    %c0_i32_0 = arith.constant 0 : i32
    %c0_i32_1 = arith.constant 0 : i32
    return %c0_i32, %c0_i32_0 : i32, i32
  }
  func.func @transform_3(%arg0: i32) -> (i32, i32) {
    %c0_i32 = arith.constant 0 : i32
    %c0_i32_0 = arith.constant 0 : i32
    %c0_i32_1 = arith.constant 0 : i32
    return %c0_i32, %c0_i32_0 : i32, i32
  }
  func.func @transform_4(%arg0: i32) -> (i32, i32) {
    %c0_i32 = arith.constant 0 : i32
    %c0_i32_0 = arith.constant 0 : i32
    %c0_i32_1 = arith.constant 0 : i32
    return %c0_i32, %c0_i32_0 : i32, i32
  }
  func.func @transform_5(%arg0: i32) -> (i32, i32) {
    %c0_i32 = arith.constant 0 : i32
    %c0_i32_0 = arith.constant 0 : i32
    %c0_i32_1 = arith.constant 0 : i32
    return %c0_i32, %c0_i32_0 : i32, i32
  }
  func.func @transform_6(%arg0: i32) -> (i32, i32) {
    %c0_i32 = arith.constant 0 : i32
    %c0_i32_0 = arith.constant 0 : i32
    %c0_i32_1 = arith.constant 0 : i32
    return %c0_i32, %c0_i32_0 : i32, i32
  }
  func.func @transform_7(%arg0: i32) -> (i32, i32) {
    %c0_i32 = arith.constant 0 : i32
    %c0_i32_0 = arith.constant 0 : i32
    %c0_i32_1 = arith.constant 0 : i32
    return %c0_i32, %c0_i32_0 : i32, i32
  }
  func.func @transform_8(%arg0: i32) -> (i32, i32) {
    %c0_i32 = arith.constant 0 : i32
    %c0_i32_0 = arith.constant 0 : i32
    %c0_i32_1 = arith.constant 0 : i32
    return %c0_i32, %c0_i32_0 : i32, i32
  }
  func.func @transform_9(%arg0: i32) -> (i32, i32) {
    %c0_i32 = arith.constant 0 : i32
    %c0_i32_0 = arith.constant 0 : i32
    %c0_i32_1 = arith.constant 0 : i32
    return %c0_i32, %c0_i32_0 : i32, i32
  }
  func.func @transform_10(%arg0: i32) -> (i32, i32, i32) {
    %c0_i32 = arith.constant 0 : i32
    %c0_i32_0 = arith.constant 0 : i32
    %c0_i32_1 = arith.constant 0 : i32
    return %arg0, %c0_i32, %c0_i32_0 : i32, i32, i32
  }
}

</mosaic_0001>

<bundles_post_ra>
// kernel: tpu_custom_call.1
= control target key start
LH: loop header
LB: loop body
LE: loop exit
PB: predicated region body
PF: predicated region fallthrough
CT: control target
= control target key end

     0   :  { %15 = vsyncpa [#allocation4], 0  ;;  %s2329_s0 = inlined_call_operand.vmem [shape: f32[2,8,4], index: 0, kind: input, shape index: {}]   ;;  %s2330_s1 = inlined_call_operand.vmem [shape: f32[2,8,128], index: 1, kind: input, shape index: {}]   ;;  %s2331_s2 = inlined_call_operand.vmem [shape: f32[4,192], index: 2, kind: input, shape index: {}]   ;;  %s2332_s3 = inlined_call_operand.vmem [shape: f32[1,192], index: 3, kind: input, shape index: {}]   ;;  %s2333_s4 = inlined_call_operand.hbm [shape: f32[64,64], index: 4, kind: input, shape index: {}]   ;;  %s2334_s5 = inlined_call_operand.hbm [shape: f32[64,64], index: 5, kind: input, shape index: {}]   ;;  %s2335_s6 = inlined_call_operand.hbm [shape: f32[64,64], index: 6, kind: input, shape index: {}]   ;;  %s2336_s7 = inlined_call_operand.vmem [shape: f32[1,64], index: 7, kind: input, shape index: {}]   ;;  %s2337_s8 = inlined_call_operand.hbm [shape: f32[128,128], index: 8, kind: input, shape index: {}]   ;;  %s2338_s9 = inlined_call_operand.vmem [shape: f32[1,128], index: 9, kind: input, shape index: {}]   ;;  %s2339_s10 = inlined_call_operand.hbm [shape: f32[2,8,128], index: 10, kind: output, shape index: {}]  }
   0x1   :  { %16 = vsyncpa [#allocation7], 0 }
   0x2   :  { %17 = vsyncpa [#allocation10], 0 }
   0x3   :  { %18 = vsyncpa [#allocation5], 0  ;;  %s44_s15 = sshll.u32 %s2334_s5, 4  ;;  %s1675_s16 = smov [#allocation6]   ;;  %s45_s15 = int_to_ptr.hbm [resolvable:$true] %s44_s15 }
   0x4   :  { %s46_s17 = sshll.u32 %s1675_s16, 4  ;;  %s31_s20 = sshll.u32 %s2333_s4, 4  ;;  %s47_s17 = int_to_ptr.vmem [resolvable:$true] %s46_s17  ;;  %s32_s20 = int_to_ptr.hbm [resolvable:$true] %s31_s20 }
   0x5   :  { %s1676_s21 = smov 128   ;;  %s1677_s22 = smov 8  }
   0x6   :  { %52 = dma.hbm_to_vmem [thread:$0]  %s45_s15, 1024, %s47_s17, [#allocation7], %s1676_s21, %s1676_s21, %s1677_s22  }
   0x7   :  { %s1678_s23 = smov [#allocation3]   ;;  %s57_s5 = sshll.u32 %s2335_s6, 4  ;;  %s58_s5 = int_to_ptr.hbm [resolvable:$true] %s57_s5 }
   0x8   :  { %s33_s24 = sshll.u32 %s1678_s23, 4  ;;  %s72_s28 = sshll.u32 %s2337_s8, 4  ;;  %s34_s24 = int_to_ptr.vmem [resolvable:$true] %s33_s24  ;;  %s73_s28 = int_to_ptr.hbm [resolvable:$true] %s72_s28 }
   0x9   :  { %39 = dma.hbm_to_vmem [thread:$0]  %s32_s20, 1024, %s34_s24, [#allocation4], %s1676_s21, %s1676_s21, %s1677_s22  }
   0xa   :  { %s1679_s29 = smov [#allocation8]   ;;  %s1680_s11 = smov [#allocation9]  }
   0xb   :  { %s59_s30 = sshll.u32 %s1679_s29, 4  ;;  %s74_s6 = sshll.u32 %s1680_s11, 4  ;;  %s60_s30 = int_to_ptr.vmem [resolvable:$true] %s59_s30  ;;  %s75_s6 = int_to_ptr.vmem [resolvable:$true] %s74_s6 }
   0xc   :  { %65 = dma.hbm_to_vmem [thread:$0]  %s58_s5, 1024, %s60_s30, [#allocation7], %s1676_s21, %s1676_s21, %s1677_s22  }
   0xd   :  { %80 = dma.hbm_to_vmem [thread:$0]  %s73_s28, 2048, %s75_s6, [#allocation10], %s1676_s21, %s1676_s21, %s1677_s22  }
   0xe   :  { %1667 = dma.done.wait [#allocation4], 1024  }
   0xf   :  { %1668 = vsyncadd [#allocation4], 4294966272 }
  0x10   :  { %1669 = dma.done.wait [#allocation7], 2048  }
  0x11   :  { %1670 = vsyncadd [#allocation7], 4294965248 }
  0x12   :  { %1671 = dma.done.wait [#allocation10], 2048  }
  0x13   :  { %1672 = vsyncadd [#allocation10], 4294965248  ;;  %v1681_v0 = vmov 0.0   ;;  %v103_v1 = vld [vmem:[%s2331_s2] sm:$0xff]  ;;  %vm121_vm0 = vcmask 1043456   ;;  %v1768_v2 = vld [vmem:[#allocation6 + $0x38] sm:$0xff]  ;;  %v197_v33 = vlaneseq }
  0x14   :  { %99 = vst [vmem:[#allocation2] sm:$0xff] %v1681_v0  ;;  %v101_v3 = vld [vmem:[%s2329_s0] sm:$0xff]  ;;  %vm114_vm1 = vcmask 31744   ;;  %v1773_v4 = vld [vmem:[#allocation3 + $0x38] sm:$0xff]  ;;  %260 = vmatpush.msra.mxu3 %v1768_v2  ;;  %403 = vmatpush.msra.mxu2 %v1768_v2  ;;  %v1779_v8 = vld [vmem:[#allocation6 + $0x30] sm:$0xff]  ;;  %vm203_vm2 = vcmask 1041409  }
  0x15   :  { %100 = vst [vmem:[#allocation2 + $0x8] sm:$0xff] %v1681_v0  ;;  %v1775_v5 = vld [vmem:[#allocation8 + $0x38] sm:$0xff]  ;;  %v1783_v9 = vld [vmem:[#allocation3 + $0x30] sm:$0xff]  ;;  %v1789_v11 = vld [vmem:[#allocation6 + $0x28] sm:$0xff]  ;;  %v1920_v35 = vand.u32 127, %v197_v33  ;;  %vm228_vm12 = vcmask 523264  }
  0x16   :  { %111 = vst [vmem:[#allocation1] ss:$2 sm:$0xff] %v103_v1  ;;  %v1785_v10 = vld [vmem:[#allocation8 + $0x30] sm:$0xff]  ;;  %v1791_v12 = vld [vmem:[#allocation3 + $0x28] sm:$0xff]  ;;  %261 = vmatpush.msra.mxu3 %v1779_v8  ;;  %404 = vmatpush.msra.mxu2 %v1779_v8  ;;  %v1799_v14 = vld [vmem:[#allocation6 + $0x20] sm:$0xff]  ;;  %vm344_vm13 = vcmask 253952  }
  0x17   :  { %v1793_v13 = vld [vmem:[#allocation8 + $0x28] sm:$0xff]  ;;  %v1801_v15 = vld [vmem:[#allocation3 + $0x20] sm:$0xff]  ;;  %v102_v17 = vld [vmem:[%s2329_s0 + $0x8] sm:$0xff]  ;;  %vm199_vm3 = vcmp.lt.s32.totalorder %v1920_v35, 32  ;;  %vm347_vm14 = vcmask 516352   ;;  %s1370_s28 = sshll.u32 %s2339_s10, 4  ;;  %s1371_s28 = int_to_ptr.hbm [resolvable:$true] %s1370_s28 }
  0x18   :  { %v1803_v16 = vld [vmem:[#allocation8 + $0x20] sm:$0xff]  ;;  %262 = vmatpush.msra.mxu3 %v1789_v11  ;;  %405 = vmatpush.msra.mxu2 %v1789_v11  ;;  %v1812_v18 = vld [vmem:[#allocation3 + $0x18] sm:$0xff]  ;;  %v1824_v21 = vld [vmem:[#allocation3 + $0x10] sm:$0xff] }
  0x19   :  { %v1814_v19 = vld [vmem:[#allocation8 + $0x18] sm:$0xff]  ;;  %v1826_v22 = vld [vmem:[#allocation8 + $0x10] sm:$0xff]  ;;  %v1830_v23 = vld [vmem:[#allocation3 + $0x8] sm:$0xff] }
  0x1a   :  { %263 = vmatpush.msra.mxu3 %v1799_v14  ;;  %406 = vmatpush.msra.mxu2 %v1799_v14  ;;  %v1820_v20 = vld [vmem:[#allocation6 + $0x18] sm:$0xff]  ;;  %v1832_v24 = vld [vmem:[#allocation8 + $0x8] sm:$0xff]  ;;  %v1838_v25 = vld [vmem:[#allocation3] sm:$0xff] }
  0x1b   :  { %v1840_v26 = vld [vmem:[#allocation8] sm:$0xff]  ;;  %v1874_v27 = vld [vmem:[#allocation6 + $0x10] sm:$0xff]  ;;  %v1877_v28 = vld [vmem:[#allocation6 + $0x8] sm:$0xff] }
  0x1c   :  { %264 = vmatpush.msra.mxu3 %v1820_v20  ;;  %407 = vmatpush.msra.mxu2 %v1820_v20  ;;  %v1880_v29 = vld [vmem:[#allocation6] sm:$0xff]  ;;  %v104_v30 = vld [vmem:[%s2332_s3] sm:$0x3]  ;;  %s1682_s3 = smov 64  }
  0x1d   :  { %v112_v6 = vld.sshfl [vmem:[#allocation1] sm:$0xff pattern:$0x75316420]  ;;  %v113_v7 = vld.sshfl [vmem:[#allocation1 + $0x8] sm:$0xff pattern:$0x75316420] }
  0x1e   :  { %1385 = vmatpush.msk.msra.mxu0 %vm121_vm0, %v112_v6  ;;  %1388 = vmatpush.msk.msra.mxu1 %vm121_vm0, %v113_v7  ;;  %v106_v32 = vperm.slane %v104_v30, 0  ;;  %v107_v37 = vperm.slane %v104_v30, 1 }
  0x1f   :  { %1386 = vmatmul.msk.f32.vlgmr.msra.gmra.mxu0 %vm114_vm1, %v101_v3  ;;  %1389 = vmatmul.msk.f32.vlgmr.msra.gmra.mxu1 %vm114_vm1, %v101_v3 }
  0x20   :  { %240 = vmatpush.msrb.mxu1 %v1773_v4  ;;  %283 = vmatpush.msrb.mxu0 %v1775_v5 }
  0x21   :  { %265 = vmatpush.msra.mxu3 %v1874_v27  ;;  %408 = vmatpush.msra.mxu2 %v1874_v27 }
  0x22   :  { %241 = vmatpush.msrb.mxu1 %v1783_v9  ;;  %284 = vmatpush.msrb.mxu0 %v1785_v10 }
  0x23   :  { %266 = vmatpush.msra.mxu3 %v1877_v28  ;;  %409 = vmatpush.msra.mxu2 %v1877_v28 }
  0x24   :  { %242 = vmatpush.msrb.mxu1 %v1791_v12  ;;  %285 = vmatpush.msrb.mxu0 %v1793_v13 }
  0x25   :  { %267 = vmatpush.msra.mxu3 %v1880_v29  ;;  %410 = vmatpush.msra.mxu2 %v1880_v29 }
  0x26   :  { %243 = vmatpush.msrb.mxu1 %v1801_v15  ;;  %286 = vmatpush.msrb.mxu0 %v1803_v16 }
  0x27   :  { %1387 = vmatmul.msk.f32.gmra.mxu0 %vm114_vm1, %v102_v17  ;;  %1390 = vmatmul.msk.f32.gmra.mxu1 %vm114_vm1, %v102_v17 }
  0x28   :  { %244 = vmatpush.msrb.mxu1 %v1812_v18  ;;  %287 = vmatpush.msrb.mxu0 %v1814_v19 }
  0x29   :  { %268 = vmatmul.f32.vlgmr.msra.gmra.mxu3 %v1681_v0  ;;  %563 = vmatpush.msrb.mxu2 %v1775_v5 }
  0x2a   :  { %245 = vmatpush.msrb.mxu1 %v1824_v21  ;;  %288 = vmatpush.msrb.mxu0 %v1826_v22 }
  0x2b   :  { %423 = vmatpush.msrb.mxu3 %v1775_v5  ;;  %564 = vmatpush.msrb.mxu2 %v1785_v10 }
  0x2c   :  { %246 = vmatpush.msrb.mxu1 %v1830_v23  ;;  %289 = vmatpush.msrb.mxu0 %v1832_v24 }
  0x2d   :  { %424 = vmatpush.msrb.mxu3 %v1785_v10  ;;  %565 = vmatpush.msrb.mxu2 %v1793_v13 }
  0x2e   :  { %247 = vmatpush.msrb.mxu1 %v1838_v25  ;;  %290 = vmatpush.msrb.mxu0 %v1840_v26 }
  0x2f   :  { %248 = vmatmul.f32.vlgmr.msrb.gmra.mxu1 %v1681_v0  ;;  %291 = vmatmul.f32.vlgmr.msrb.gmra.mxu0 %v1681_v0 }
  0x30   :  { %383 = vmatpush.msra.mxu1 %v1773_v4  ;;  %523 = vmatpush.msra.mxu0 %v1773_v4 }
  0x31   :  { %425 = vmatpush.msrb.mxu3 %v1793_v13  ;;  %566 = vmatpush.msrb.mxu2 %v1803_v16 }
  0x32   :  { %384 = vmatpush.msra.mxu1 %v1783_v9  ;;  %524 = vmatpush.msra.mxu0 %v1783_v9 }
  0x33   :  { %426 = vmatpush.msrb.mxu3 %v1803_v16  ;;  %567 = vmatpush.msrb.mxu2 %v1814_v19 }
  0x34   :  { %385 = vmatpush.msra.mxu1 %v1791_v12  ;;  %525 = vmatpush.msra.mxu0 %v1791_v12 }
  0x35   :  { %427 = vmatpush.msrb.mxu3 %v1814_v19  ;;  %568 = vmatpush.msrb.mxu2 %v1826_v22 }
  0x36   :  { %386 = vmatpush.msra.mxu1 %v1801_v15  ;;  %526 = vmatpush.msra.mxu0 %v1801_v15 }
  0x37   :  { %428 = vmatpush.msrb.mxu3 %v1826_v22  ;;  %569 = vmatpush.msrb.mxu2 %v1832_v24 }
  0x38   :  { %387 = vmatpush.msra.mxu1 %v1812_v18  ;;  %527 = vmatpush.msra.mxu0 %v1812_v18 }
  0x39   :  { %429 = vmatpush.msrb.mxu3 %v1832_v24  ;;  %570 = vmatpush.msrb.mxu2 %v1840_v26 }
  0x3a   :  { %388 = vmatpush.msra.mxu1 %v1824_v21  ;;  %528 = vmatpush.msra.mxu0 %v1824_v21 }
  0x3b   :  { %430 = vmatpush.msrb.mxu3 %v1840_v26 }
  0x3c   :  { %389 = vmatpush.msra.mxu1 %v1830_v23  ;;  %529 = vmatpush.msra.mxu0 %v1830_v23 }
  0x3d   :  { %663 = vmatpush.msra.mxu3 %v1773_v4 }
  0x3e   :  { %390 = vmatpush.msra.mxu1 %v1838_v25  ;;  %530 = vmatpush.msra.mxu0 %v1838_v25 }
  0x3f   :  { %664 = vmatpush.msra.mxu3 %v1783_v9 }
  0x40   :  { %543 = vmatpush.msrb.mxu1 %v1768_v2  ;;  %683 = vmatpush.msrb.mxu0 %v1768_v2 }
  0x41   :  { %665 = vmatpush.msra.mxu3 %v1791_v12 }
  0x42   :  { %544 = vmatpush.msrb.mxu1 %v1779_v8  ;;  %684 = vmatpush.msrb.mxu0 %v1779_v8 }
  0x43   :  { %666 = vmatpush.msra.mxu3 %v1801_v15 }
  0x44   :  { %545 = vmatpush.msrb.mxu1 %v1789_v11  ;;  %685 = vmatpush.msrb.mxu0 %v1789_v11 }
  0x45   :  { %667 = vmatpush.msra.mxu3 %v1812_v18 }
  0x46   :  { %546 = vmatpush.msrb.mxu1 %v1799_v14  ;;  %686 = vmatpush.msrb.mxu0 %v1799_v14 }
  0x47   :  { %668 = vmatpush.msra.mxu3 %v1824_v21 }
  0x48   :  { %547 = vmatpush.msrb.mxu1 %v1820_v20  ;;  %687 = vmatpush.msrb.mxu0 %v1820_v20 }
  0x49   :  { %669 = vmatpush.msra.mxu3 %v1830_v23 }
  0x4a   :  { %548 = vmatpush.msrb.mxu1 %v1874_v27  ;;  %688 = vmatpush.msrb.mxu0 %v1874_v27 }
  0x4b   :  { %670 = vmatpush.msra.mxu3 %v1838_v25 }
  0x4c   :  { %549 = vmatpush.msrb.mxu1 %v1877_v28  ;;  %689 = vmatpush.msrb.mxu0 %v1877_v28 }
  0x4e   :  { %550 = vmatpush.msrb.mxu1 %v1880_v29  ;;  %690 = vmatpush.msrb.mxu0 %v1880_v29 }
  0x9c   :  { %v143_v31 = vpop.f32.mrf.mxu0  ;;  %v166_v36 = vpop.f32.mrf.mxu1 }
  0x9d   :  { %v144_v34 = vadd.f32 %v143_v31, %v106_v32  ;;  %v167_v7 = vadd.f32 %v166_v36, %v107_v37 }
  0x9f   :  { %v350_v40 = vrot.slane %v144_v34, 1  ;;  %v488_v41 = vrot.slane %v144_v34, 2  ;;  %v206_v42 = vrot.slane %v144_v34, 7  ;;  %v353_v43 = vrot.slane %v144_v34, 6 }
  0xa0   :  { %v492_v44 = vrot.slane %v144_v34, 5  ;;  %v632_v45 = vrot.slane %v144_v34, 4  ;;  %v628_v57 = vrot.slane %v144_v34, 3 }
  0xa4   :  { %v146_v38 = vpop.f32.mrf.mxu0  ;;  %v169_v0 = vpop.f32.mrf.mxu1 }
  0xa5   :  { %v147_v39 = vadd.f32 %v146_v38, %v106_v32  ;;  %v170_v17 = vadd.f32 %v169_v0, %v107_v37 }
  0xa7   :  { %v351_v46 = vsel %vm203_vm2, %v147_v39, %v350_v40  ;;  %v489_v47 = vrot.slane %v147_v39, 1  ;;  %v202_v48 = vrot.slane %v147_v39, 7  ;;  %v207_v49 = vrot.slane %v147_v39, 6 }
  0xa8   :  { %358 = vrot.lane.b32.xlu1 %v351_v46, %s1682_s3  ;;  %v354_v50 = vrot.slane %v147_v39, 5  ;;  %v493_v51 = vrot.slane %v147_v39, 4  ;;  %v633_v52 = vrot.slane %v147_v39, 3  ;;  %v629_v53 = vrot.slane %v147_v39, 2 }
  0xa9   :  { %v490_v54 = vsel %vm203_vm2, %v489_v47, %v488_v41  ;;  %v204_v55 = vsel %vm203_vm2, %v202_v48, %v144_v34  ;;  %v208_v56 = vsel %vm203_vm2, %v207_v49, %v206_v42  ;;  %v220_v33 = vrot.slane %v170_v17, 7 }
  0xaa   :  { %497 = vrot.lane.b32.xlu2 %v490_v54, %s1682_s3  ;;  %211 = vrot.lane.b32.xlu0 %v204_v55, %s1682_s3  ;;  %v210_v58 = vsel %vm199_vm3, %v204_v55, %v208_v56  ;;  %v355_v59 = vsel %vm203_vm2, %v354_v50, %v353_v43  ;;  %v494_v60 = vsel %vm203_vm2, %v493_v51, %v492_v44  ;;  %v223_v34 = vrot.slane %v167_v7, 7 }
  0xab   :  { %v634_v61 = vsel %vm203_vm2, %v633_v52, %v632_v45  ;;  %v630_v62 = vsel %vm203_vm2, %v629_v53, %v628_v57  ;;  %v1938_v63 = vsel %vm199_vm3, %v351_v46, %v355_v59  ;;  %v1942_v1 = vsel %vm199_vm3, %v490_v54, %v494_v60 }
  0xac   :  { %v1946_v3 = vsel %vm199_vm3, %v630_v62, %v634_v61  ;;  %v1950_v6 = vsel %vm199_vm3, %v634_v61, %v630_v62  ;;  %v1954_v30 = vsel %vm199_vm3, %v494_v60, %v490_v54  ;;  %v1958_v31 = vsel %vm199_vm3, %v355_v59, %v351_v46 }
  0xad   :  { %v1962_v32 = vsel %vm199_vm3, %v208_v56, %v204_v55  ;;  %v224_v38 = vrot.slane %v170_v17, 6  ;;  %v1968_v36 = vsel %vm203_vm2, %v220_v33, %v167_v7  ;;  %v365_v40 = vrot.slane %v167_v7, 1 }
  0xae   :  { %2340 = vst [vmem:[#allocation16_spill] sm:$0xff] %v1962_v32  ;;  %v368_v41 = vrot.slane %v167_v7, 6  ;;  %v369_v42 = vrot.slane %v170_v17, 5  ;;  %v504_v43 = vrot.slane %v167_v7, 2  ;;  %v505_v44 = vrot.slane %v170_v17, 1 }
  0xaf   :  { %v1971_v37 = vsel %vm203_vm2, %v224_v38, %v223_v34  ;;  %v508_v45 = vrot.slane %v167_v7, 5  ;;  %v509_v46 = vrot.slane %v170_v17, 4  ;;  %v644_v47 = vrot.slane %v167_v7, 3 }
  0xb0   :  { %361 = vrot.lane.b32.xlu1 %v355_v59, %s1682_s3  ;;  %v1977_v39 = vsel %vm199_vm3, %v1971_v37, %v1968_v36  ;;  %v1982_v48 = vsel %vm203_vm2, %v170_v17, %v365_v40  ;;  %v1985_v49 = vsel %vm203_vm2, %v369_v42, %v368_v41  ;;  %v645_v50 = vrot.slane %v170_v17, 2 }
  0xb1   :  { %2341 = vst [vmem:[#allocation17_spill] sm:$0xff] %v1977_v39  ;;  %v648_v51 = vrot.slane %v167_v7, 4  ;;  %v1988_v52 = vsel %vm203_vm2, %v505_v44, %v504_v43  ;;  %v1991_v53 = vsel %vm203_vm2, %v509_v46, %v508_v45  ;;  %v649_v54 = vrot.slane %v170_v17, 3  ;;  %v269_v44 = vpop.f32.mrf.mxu3 }
  0xb2   :  { %500 = vrot.lane.b32.xlu2 %v494_v60, %s1682_s3  ;;  %214 = vrot.lane.b32.xlu0 %v208_v56, %s1682_s3  ;;  %v1994_v55 = vsel %vm203_vm2, %v645_v50, %v644_v47  ;;  %v2000_v56 = vsel %vm199_vm3, %v1991_v53, %v1988_v52  ;;  %v2009_v59 = vsel %vm199_vm3, %v1985_v49, %v1982_v48 }
  0xb3   :  { %v2003_v57 = vsel %vm203_vm2, %v649_v54, %v648_v51 }
  0xb4   :  { %v2015_v60 = vsel %vm199_vm3, %v2003_v57, %v1994_v55 }
  0xb8   :  { %640 = vrot.lane.b32.xlu1 %v634_v61, %s1682_s3  ;;  %v249_v61 = vpop.f32.mrf.mxu1 }
  0xba   :  { %637 = vrot.lane.b32.xlu0 %v630_v62, %s1682_s3  ;;  %v295_v62 = vadd.f32 %v249_v61, %v210_v58 }
  0xbc   :  { %v1391_v0 = vmul.f32 -1.442695, %v295_v62  ;;  %v2036_v62 = vld [vmem:[%s2336_s7] ss:$0 sm:$0xff] }
  0xbe   :  { %1441 = vpow2.f32 %v1391_v0 }
  0xc4   :  { %v1442_v7 = vpop.eup %1441 }
  0xc5   :  { %v299_v17 = vadd.f32 1.0, %v1442_v7  ;;  %v292_v7 = vpop.f32.mrf.mxu0 }
  0xc7   :  { %1443 = vrcp.f32 %v299_v17  ;;  %v311_v54 = vand.u32 2147483648, %v299_v17  ;;  %vm305_vm5 = vweird.f32 %v299_v17  ;;  %v309_v0 = vand.u32 2147483647, %v299_v17 }
  0xc9   :  { %vm310_vm7 = vcmp.eq.f32.partialorder %v309_v0, 8.507059e+37 }
  0xcd   :  { %v1444_v33 = vpop.eup %1443 }
  0xce   :  { %v301_v38 = vmul.f32 %v1444_v33, %v299_v17  ;;  %vm306_vm4 = vweird.f32 %v1444_v33 }
  0xcf   :  { %vm307_vm6 = vmor %vm305_vm5, %vm306_vm4 }
  0xd0   :  { %v302_v41 = vsub.f32 1.0, %v301_v38 }
  0xd2   :  { %v303_v43 = vmul.f32 %v1444_v33, %v302_v41  ;;  %v312_v41 = vor.u32 1.1754944e-38, %v311_v54 }
  0xd4   :  { %v304_v51 = vadd.f32 %v1444_v33, %v303_v43 }
  0xd6   :  { %v308_v38 = vsel %vm307_vm6, %v1444_v33, %v304_v51 }
 0x11a   :  { %v2017_v34 = vpop.permute.xlu1 %358 }
 0x11c   :  { %v212_v40 = vpop.permute.xlu0 %211 }
 0x122   :  { %v2019_v42 = vpop.permute.xlu1 %361 }
 0x123   :  { %v2025_v58 = vsel %vm199_vm3, %v2019_v42, %v2017_v34 }
 0x124   :  { %v215_v45 = vpop.permute.xlu0 %214 }
 0x125   :  { %v217_v46 = vsel %vm199_vm3, %v212_v40, %v215_v45  ;;  %v2031_v47 = vsel %vm199_vm3, %v215_v45, %v212_v40  ;;  %v293_v40 = vadd.f32 %v2036_v62, %v292_v7 }
 0x126   :  { %v315_v50 = vadd.f32 %v269_v44, %v217_v46  ;;  %v313_v44 = vsel %vm310_vm7, %v312_v41, %v308_v38 }
 0x127   :  { %v335_v45 = vmul.f32 %v313_v44, %v293_v40 }
 0x128   :  { %v1392_v61 = vmul.f32 -1.442695, %v315_v50  ;;  %v227_v50 = vsel %vm199_vm3, %v1968_v36, %v1971_v37 }
 0x129   :  { %v336_v39 = vadd.f32 %v335_v45, %v227_v50 }
 0x12a   :  { %1445 = vpow2.f32 %v1392_v61 }
 0x130   :  { %v1446_v43 = vpop.eup %1445 }
 0x131   :  { %v319_v46 = vadd.f32 1.0, %v1446_v43 }
 0x133   :  { %1447 = vrcp.f32 %v319_v46  ;;  %v331_v33 = vand.u32 2147483648, %v319_v46  ;;  %v329_v54 = vand.u32 2147483647, %v319_v46  ;;  %vm325_vm9 = vweird.f32 %v319_v46 }
 0x134   :  { %1449 = vtanh.f32 %v336_v39 }
 0x135   :  { %v332_v38 = vor.u32 1.1754944e-38, %v331_v33  ;;  %vm330_vm11 = vcmp.eq.f32.partialorder %v329_v54, 8.507059e+37 }
 0x139   :  { %v1448_v17 = vpop.eup %1447 }
 0x13a   :  { %v321_v32 = vmul.f32 %v1448_v17, %v319_v46  ;;  %vm326_vm8 = vweird.f32 %v1448_v17  ;;  %v1450_v0 = vpop.eup %1449  ;;  %v364_v46 = vsel %vm199_vm3, %v2017_v34, %v2019_v42 }
 0x13b   :  { %vm327_vm10 = vmor %vm325_vm9, %vm326_vm8  ;;  %v338_v41 = vsub.f32 0.0, %v1450_v0 }
 0x13c   :  { %v322_v61 = vsub.f32 1.0, %v321_v32 }
 0x13e   :  { %v323_v51 = vmul.f32 %v1448_v17, %v322_v61 }
 0x140   :  { %v324_v7 = vadd.f32 %v1448_v17, %v323_v51 }
 0x142   :  { %v328_v40 = vsel %vm327_vm10, %v1448_v17, %v324_v7 }
 0x143   :  { %v333_v44 = vsel %vm330_vm11, %v332_v38, %v328_v40 }
 0x144   :  { %v339_v36 = vmul.f32 %v338_v41, %v333_v44 }
 0x146   :  { %v2043_v37 = vadd.f32 %v1450_v0, %v339_v36 }
 0x148   :  { %v342_v32 = vrot.slane %v2043_v37, 1  ;;  %1393 = vmatmul.msk.f32.vlgmr.msra.gmra.mxu1 %vm228_vm12, %v2043_v37  ;;  %1394 = vmatmul.msk.f32.vlgmr.msra.gmra.mxu2 %vm228_vm12, %v2043_v37  ;;  %345 = vst.msk [vmem:[#allocation2] sm:$0x1] %vm344_vm13, %v2043_v37 }
 0x149   :  { %1395 = vmatmul.msk.f32.vlgmr.msrb.gmra.mxu3 %vm228_vm12, %v2043_v37  ;;  %348 = vst.msk [vmem:[#allocation2 + $0x7] sm:$0x1] %vm347_vm14, %v2043_v37  ;;  %703 = vmatpush.msra.mxu1 %v1775_v5 }
 0x14a   :  { %346 = vst.msk [vmem:[#allocation2 + $0x8] sm:$0x1] %vm344_vm13, %v342_v32  ;;  %781 = vmatpush.msra.mxu2 %v1773_v4  ;;  %801 = vmatpush.msrb.mxu3 %v1768_v2 }
 0x14b   :  { %349 = vst.msk [vmem:[#allocation2 + $0xf] sm:$0x1] %vm347_vm14, %v342_v32  ;;  %704 = vmatpush.msra.mxu1 %v1785_v10 }
 0x14c   :  { %782 = vmatpush.msra.mxu2 %v1783_v9  ;;  %802 = vmatpush.msrb.mxu3 %v1779_v8 }
 0x14d   :  { %705 = vmatpush.msra.mxu1 %v1793_v13 }
 0x14e   :  { %783 = vmatpush.msra.mxu2 %v1791_v12  ;;  %803 = vmatpush.msrb.mxu3 %v1789_v11 }
 0x14f   :  { %706 = vmatpush.msra.mxu1 %v1803_v16 }
 0x150   :  { %784 = vmatpush.msra.mxu2 %v1801_v15  ;;  %804 = vmatpush.msrb.mxu3 %v1799_v14 }
 0x151   :  { %707 = vmatpush.msra.mxu1 %v1814_v19 }
 0x152   :  { %785 = vmatpush.msra.mxu2 %v1812_v18  ;;  %805 = vmatpush.msrb.mxu3 %v1820_v20 }
 0x153   :  { %708 = vmatpush.msra.mxu1 %v1826_v22 }
 0x154   :  { %786 = vmatpush.msra.mxu2 %v1824_v21  ;;  %806 = vmatpush.msrb.mxu3 %v1874_v27 }
 0x155   :  { %709 = vmatpush.msra.mxu1 %v1832_v24 }
 0x156   :  { %787 = vmatpush.msra.mxu2 %v1830_v23  ;;  %807 = vmatpush.msrb.mxu3 %v1877_v28 }
 0x157   :  { %710 = vmatpush.msra.mxu1 %v1840_v26 }
 0x158   :  { %788 = vmatpush.msra.mxu2 %v1838_v25  ;;  %808 = vmatpush.msrb.mxu3 %v1880_v29 }
 0x1c5   :  { %v392_v39 = vpop.f32.mrf.mxu1 }
 0x1c6   :  { %v435_v43 = vadd.f32 %v392_v39, %v1938_v63 }
 0x1c8   :  { %v1396_v45 = vmul.f32 -1.442695, %v435_v43 }
 0x1ca   :  { %1451 = vpow2.f32 %v1396_v45 }
 0x1cb   :  { %v412_v50 = vpop.f32.mrf.mxu2 }
 0x1cc   :  { %v455_v17 = vadd.f32 %v412_v50, %v364_v46  ;;  %v432_v32 = vpop.f32.mrf.mxu3 }
 0x1cd   :  { %v433_v45 = vadd.f32 %v2036_v62, %v432_v32 }
 0x1ce   :  { %v1397_v61 = vmul.f32 -1.442695, %v455_v17 }
 0x1d0   :  { %v1452_v33 = vpop.eup %1451  ;;  %1453 = vpow2.f32 %v1397_v61 }
 0x1d1   :  { %v439_v51 = vadd.f32 1.0, %v1452_v33  ;;  %v372_v33 = vsel %vm199_vm3, %v1982_v48, %v1985_v49  ;;  %v2132_v49 = vpop.permute.xlu2 %497 }
 0x1d3   :  { %1455 = vrcp.f32 %v439_v51  ;;  %v451_v41 = vand.u32 2147483648, %v439_v51  ;;  %v449_v44 = vand.u32 2147483647, %v439_v51  ;;  %vm445_vm0 = vweird.f32 %v439_v51 }
 0x1d5   :  { %v452_v39 = vor.u32 1.1754944e-38, %v451_v41  ;;  %vm450_vm2 = vcmp.eq.f32.partialorder %v449_v44, 8.507059e+37 }
 0x1d6   :  { %v1454_v54 = vpop.eup %1453 }
 0x1d7   :  { %v459_v0 = vadd.f32 1.0, %v1454_v54 }
 0x1d9   :  { %v1456_v7 = vpop.eup %1455  ;;  %1457 = vrcp.f32 %v459_v0  ;;  %vm465_vm5 = vweird.f32 %v459_v0 }
 0x1da   :  { %v441_v38 = vmul.f32 %v1456_v7, %v439_v51  ;;  %vm446_vm15 = vweird.f32 %v1456_v7  ;;  %v471_v51 = vand.u32 2147483648, %v459_v0 }
 0x1db   :  { %vm447_vm1 = vmor %vm445_vm0, %vm446_vm15 }
 0x1dc   :  { %v442_v63 = vsub.f32 1.0, %v441_v38 }
 0x1de   :  { %v443_v40 = vmul.f32 %v1456_v7, %v442_v63  ;;  %v469_v63 = vand.u32 2147483647, %v459_v0 }
 0x1df   :  { %v1458_v36 = vpop.eup %1457 }
 0x1e0   :  { %v461_v34 = vmul.f32 %v1458_v36, %v459_v0  ;;  %v444_v42 = vadd.f32 %v1456_v7, %v443_v40  ;;  %vm466_vm4 = vweird.f32 %v1458_v36  ;;  %vm470_vm7 = vcmp.eq.f32.partialorder %v469_v63, 8.507059e+37 }
 0x1e1   :  { %vm467_vm6 = vmor %vm465_vm5, %vm466_vm4 }
 0x1e2   :  { %v462_v43 = vsub.f32 1.0, %v461_v34  ;;  %v448_v46 = vsel %vm447_vm1, %v1456_v7, %v444_v42  ;;  %v472_v7 = vor.u32 1.1754944e-38, %v471_v51 }
 0x1e3   :  { %v453_v50 = vsel %vm450_vm2, %v452_v39, %v448_v46 }
 0x1e4   :  { %v475_v17 = vmul.f32 %v453_v50, %v433_v45  ;;  %v463_v61 = vmul.f32 %v1458_v36, %v462_v43 }
 0x1e6   :  { %v476_v54 = vadd.f32 %v475_v17, %v372_v33  ;;  %v464_v38 = vadd.f32 %v1458_v36, %v463_v61 }
 0x1e8   :  { %1459 = vtanh.f32 %v476_v54  ;;  %v468_v41 = vsel %vm467_vm6, %v1458_v36, %v464_v38 }
 0x1e9   :  { %v473_v32 = vsel %vm470_vm7, %v472_v7, %v468_v41 }
 0x1ee   :  { %v1460_v40 = vpop.eup %1459 }
 0x1ef   :  { %v478_v44 = vsub.f32 %v2043_v37, %v1460_v40  ;;  %v2134_v37 = vpop.permute.xlu2 %500 }
 0x1f0   :  { %v503_v36 = vsel %vm199_vm3, %v2132_v49, %v2134_v37 }
 0x1f1   :  { %v479_v34 = vmul.f32 %v478_v44, %v473_v32 }
 0x1f3   :  { %v2093_v42 = vadd.f32 %v1460_v40, %v479_v34 }
 0x1f5   :  { %v482_v48 = vrot.slane %v2093_v42, 1  ;;  %484 = vst.msk [vmem:[#allocation2 + $0x1] sm:$0x1] %vm344_vm13, %v2093_v42  ;;  %1398 = vmatmul.msk.f32.vlgmr.msra.gmra.mxu0 %vm228_vm12, %v2093_v42  ;;  %1399 = vmatmul.msk.f32.vlgmr.msrb.gmra.mxu1 %vm228_vm12, %v2093_v42 }
 0x1f6   :  { %486 = vst.msk [vmem:[#allocation2 + $0x6] sm:$0x1] %vm347_vm14, %v2093_v42  ;;  %1400 = vmatmul.msk.f32.vlgmr.msrb.gmra.mxu2 %vm228_vm12, %v2093_v42  ;;  %821 = vmatpush.msra.mxu0 %v1775_v5 }
 0x1f7   :  { %485 = vst.msk [vmem:[#allocation2 + $0x9] sm:$0x1] %vm344_vm13, %v482_v48  ;;  %899 = vmatpush.msrb.mxu1 %v1773_v4  ;;  %919 = vmatpush.msrb.mxu2 %v1768_v2 }
 0x1f8   :  { %487 = vst.msk [vmem:[#allocation2 + $0xe] sm:$0x1] %vm347_vm14, %v482_v48  ;;  %822 = vmatpush.msra.mxu0 %v1785_v10 }
 0x1f9   :  { %900 = vmatpush.msrb.mxu1 %v1783_v9  ;;  %920 = vmatpush.msrb.mxu2 %v1779_v8 }
 0x1fa   :  { %823 = vmatpush.msra.mxu0 %v1793_v13 }
 0x1fb   :  { %901 = vmatpush.msrb.mxu1 %v1791_v12  ;;  %921 = vmatpush.msrb.mxu2 %v1789_v11 }
 0x1fc   :  { %824 = vmatpush.msra.mxu0 %v1803_v16 }
 0x1fd   :  { %902 = vmatpush.msrb.mxu1 %v1801_v15  ;;  %922 = vmatpush.msrb.mxu2 %v1799_v14 }
 0x1fe   :  { %825 = vmatpush.msra.mxu0 %v1814_v19 }
 0x1ff   :  { %903 = vmatpush.msrb.mxu1 %v1812_v18  ;;  %923 = vmatpush.msrb.mxu2 %v1820_v20 }
 0x200   :  { %826 = vmatpush.msra.mxu0 %v1826_v22 }
 0x201   :  { %904 = vmatpush.msrb.mxu1 %v1824_v21  ;;  %924 = vmatpush.msrb.mxu2 %v1874_v27 }
 0x202   :  { %827 = vmatpush.msra.mxu0 %v1832_v24 }
 0x203   :  { %905 = vmatpush.msrb.mxu1 %v1830_v23  ;;  %925 = vmatpush.msrb.mxu2 %v1877_v28 }
 0x204   :  { %828 = vmatpush.msra.mxu0 %v1840_v26 }
 0x205   :  { %906 = vmatpush.msrb.mxu1 %v1838_v25  ;;  %926 = vmatpush.msrb.mxu2 %v1880_v29 }
 0x272   :  { %v532_v0 = vpop.f32.mrf.mxu0  ;;  %v552_v39 = vpop.f32.mrf.mxu1 }
 0x273   :  { %v575_v43 = vadd.f32 %v532_v0, %v1942_v1  ;;  %v595_v45 = vadd.f32 %v552_v39, %v503_v36 }
 0x275   :  { %v1401_v46 = vmul.f32 -1.442695, %v575_v43  ;;  %v1402_v50 = vmul.f32 -1.442695, %v595_v45 }
 0x277   :  { %1461 = vpow2.f32 %v1401_v46 }
 0x278   :  { %1463 = vpow2.f32 %v1402_v50  ;;  %v512_v50 = vsel %vm199_vm3, %v1988_v52, %v1991_v53 }
 0x279   :  { %v572_v32 = vpop.f32.mrf.mxu2 }
 0x27a   :  { %v573_v36 = vadd.f32 %v2036_v62, %v572_v32 }
 0x27d   :  { %v1462_v17 = vpop.eup %1461 }
 0x27e   :  { %v1464_v61 = vpop.eup %1463  ;;  %v579_v33 = vadd.f32 1.0, %v1462_v17 }
 0x27f   :  { %v599_v54 = vadd.f32 1.0, %v1464_v61 }
 0x280   :  { %1465 = vrcp.f32 %v579_v33  ;;  %v591_v7 = vand.u32 2147483648, %v579_v33  ;;  %v589_v1 = vand.u32 2147483647, %v579_v33  ;;  %vm585_vm9 = vweird.f32 %v579_v33 }
 0x281   :  { %1467 = vrcp.f32 %v599_v54  ;;  %vm605_vm0 = vweird.f32 %v599_v54 }
 0x282   :  { %v592_v0 = vor.u32 1.1754944e-38, %v591_v7  ;;  %vm590_vm11 = vcmp.eq.f32.partialorder %v589_v1, 8.507059e+37 }
 0x286   :  { %v1466_v38 = vpop.eup %1465 }
 0x287   :  { %v1468_v51 = vpop.eup %1467  ;;  %v581_v63 = vmul.f32 %v1466_v38, %v579_v33  ;;  %vm586_vm8 = vweird.f32 %v1466_v38  ;;  %v611_v33 = vand.u32 2147483648, %v599_v54 }
 0x288   :  { %v601_v40 = vmul.f32 %v1468_v51, %v599_v54  ;;  %vm587_vm10 = vmor %vm585_vm9, %vm586_vm8  ;;  %vm606_vm15 = vweird.f32 %v1468_v51 }
 0x289   :  { %v582_v41 = vsub.f32 1.0, %v581_v63  ;;  %v609_v63 = vand.u32 2147483647, %v599_v54  ;;  %vm607_vm1 = vmor %vm605_vm0, %vm606_vm15 }
 0x28a   :  { %v602_v48 = vsub.f32 1.0, %v601_v40 }
 0x28b   :  { %v583_v44 = vmul.f32 %v1466_v38, %v582_v41  ;;  %vm610_vm2 = vcmp.eq.f32.partialorder %v609_v63, 8.507059e+37 }
 0x28c   :  { %v603_v46 = vmul.f32 %v1468_v51, %v602_v48 }
 0x28d   :  { %v584_v34 = vadd.f32 %v1466_v38, %v583_v44 }
 0x28e   :  { %v604_v61 = vadd.f32 %v1468_v51, %v603_v46 }
 0x28f   :  { %v588_v39 = vsel %vm587_vm10, %v1466_v38, %v584_v34  ;;  %v612_v38 = vor.u32 1.1754944e-38, %v611_v33  ;;  %v652_v33 = vsel %vm199_vm3, %v1994_v55, %v2003_v57  ;;  %v2214_v57 = vld [vmem:[#allocation8 + $0x38] sm:$0xff] }
 0x290   :  { %v593_v43 = vsel %vm590_vm11, %v592_v0, %v588_v39  ;;  %v608_v41 = vsel %vm607_vm1, %v1468_v51, %v604_v61 }
 0x291   :  { %v615_v45 = vmul.f32 %v593_v43, %v573_v36  ;;  %v613_v44 = vsel %vm610_vm2, %v612_v38, %v608_v41 }
 0x293   :  { %v616_v17 = vadd.f32 %v615_v45, %v512_v50 }
 0x295   :  { %1469 = vtanh.f32 %v616_v17 }
 0x29b   :  { %v1470_v40 = vpop.eup %1469 }
 0x29c   :  { %v618_v7 = vsub.f32 %v2093_v42, %v1470_v40 }
 0x29e   :  { %v619_v1 = vmul.f32 %v618_v7, %v613_v44 }
 0x2a0   :  { %v2147_v32 = vadd.f32 %v1470_v40, %v619_v1 }
 0x2a2   :  { %v622_v52 = vrot.slane %v2147_v32, 1  ;;  %624 = vst.msk [vmem:[#allocation2 + $0x2] sm:$0x1] %vm344_vm13, %v2147_v32  ;;  %1403 = vmatmul.msk.f32.vlgmr.msra.gmra.mxu3 %vm228_vm12, %v2147_v32  ;;  %1404 = vmatmul.msk.f32.vlgmr.msrb.gmra.mxu0 %vm228_vm12, %v2147_v32 }
 0x2a3   :  { %626 = vst.msk [vmem:[#allocation2 + $0x5] sm:$0x1] %vm347_vm14, %v2147_v32  ;;  %1405 = vmatmul.msk.f32.vlgmr.msra.gmra.mxu1 %vm228_vm12, %v2147_v32  ;;  %939 = vmatpush.msra.mxu3 %v1775_v5 }
 0x2a4   :  { %625 = vst.msk [vmem:[#allocation2 + $0xa] sm:$0x1] %vm344_vm13, %v622_v52  ;;  %1017 = vmatpush.msrb.mxu0 %v1773_v4  ;;  %1037 = vmatpush.msra.mxu1 %v1768_v2  ;;  %v2186_v2 = vpop.permute.xlu0 %637  ;;  %v2188_v4 = vpop.permute.xlu1 %640 }
 0x2a5   :  { %627 = vst.msk [vmem:[#allocation2 + $0xd] sm:$0x1] %vm347_vm14, %v622_v52  ;;  %940 = vmatpush.msra.mxu3 %v1785_v10  ;;  %v643_v5 = vsel %vm199_vm3, %v2186_v2, %v2188_v4 }
 0x2a6   :  { %1018 = vmatpush.msrb.mxu0 %v1783_v9  ;;  %1038 = vmatpush.msra.mxu1 %v1779_v8 }
 0x2a7   :  { %941 = vmatpush.msra.mxu3 %v1793_v13 }
 0x2a8   :  { %1019 = vmatpush.msrb.mxu0 %v1791_v12  ;;  %1039 = vmatpush.msra.mxu1 %v1789_v11 }
 0x2a9   :  { %942 = vmatpush.msra.mxu3 %v1803_v16 }
 0x2aa   :  { %1020 = vmatpush.msrb.mxu0 %v1801_v15  ;;  %1040 = vmatpush.msra.mxu1 %v1799_v14 }
 0x2ab   :  { %943 = vmatpush.msra.mxu3 %v1814_v19 }
 0x2ac   :  { %1021 = vmatpush.msrb.mxu0 %v1812_v18  ;;  %1041 = vmatpush.msra.mxu1 %v1820_v20 }
 0x2ad   :  { %944 = vmatpush.msra.mxu3 %v1826_v22 }
 0x2ae   :  { %1022 = vmatpush.msrb.mxu0 %v1824_v21  ;;  %1042 = vmatpush.msra.mxu1 %v1874_v27 }
 0x2af   :  { %945 = vmatpush.msra.mxu3 %v1832_v24 }
 0x2b0   :  { %1023 = vmatpush.msrb.mxu0 %v1830_v23  ;;  %1043 = vmatpush.msra.mxu1 %v1877_v28 }
 0x2b1   :  { %946 = vmatpush.msra.mxu3 %v1840_v26 }
 0x2b2   :  { %1024 = vmatpush.msrb.mxu0 %v1838_v25  ;;  %1044 = vmatpush.msra.mxu1 %v1880_v29 }
 0x31f   :  { %v692_v8 = vpop.f32.mrf.mxu0 }
 0x320   :  { %v735_v9 = vadd.f32 %v692_v8, %v643_v5  ;;  %v712_v36 = vpop.f32.mrf.mxu1 }
 0x321   :  { %v713_v45 = vadd.f32 %v2036_v62, %v712_v36 }
 0x322   :  { %v1407_v10 = vmul.f32 -1.442695, %v735_v9 }
 0x324   :  { %1471 = vpow2.f32 %v1407_v10  ;;  %v1531_v10 = vld [vmem:[#allocation6 + $0x38] sm:$0xff] }
 0x325   :  { %v672_v11 = vpop.f32.mrf.mxu3 }
 0x326   :  { %v715_v12 = vadd.f32 %v672_v11, %v1946_v3  ;;  %v2218_v11 = vld [vmem:[#allocation8 + $0x30] sm:$0xff] }
 0x328   :  { %v1406_v13 = vmul.f32 -1.442695, %v715_v12  ;;  %v1533_v12 = vld [vmem:[#allocation3 + $0x30] sm:$0xff] }
 0x32a   :  { %1473 = vpow2.f32 %v1406_v13  ;;  %v1472_v14 = vpop.eup %1471  ;;  %v1534_v13 = vld [vmem:[#allocation6 + $0x30] sm:$0xff] }
 0x32b   :  { %v739_v16 = vadd.f32 1.0, %v1472_v14  ;;  %v2222_v14 = vld [vmem:[#allocation8 + $0x28] sm:$0xff] }
 0x32d   :  { %v751_v40 = vand.u32 2147483648, %v739_v16  ;;  %vm745_vm9 = vweird.f32 %v739_v16  ;;  %v749_v38 = vand.u32 2147483647, %v739_v16 }
 0x32f   :  { %v752_v1 = vor.u32 1.1754944e-38, %v751_v40  ;;  %vm750_vm11 = vcmp.eq.f32.partialorder %v749_v38, 8.507059e+37 }
 0x330   :  { %v1474_v15 = vpop.eup %1473 }
 0x331   :  { %v719_v18 = vadd.f32 1.0, %v1474_v15  ;;  %v1536_v15 = vld [vmem:[#allocation3 + $0x28] sm:$0xff] }
 0x333   :  { %1475 = vrcp.f32 %v719_v18  ;;  %v731_v34 = vand.u32 2147483648, %v719_v18  ;;  %v729_v0 = vand.u32 2147483647, %v719_v18  ;;  %vm725_vm5 = vweird.f32 %v719_v18 }
 0x334   :  { %1477 = vrcp.f32 %v739_v16 }
 0x335   :  { %v732_v43 = vor.u32 1.1754944e-38, %v731_v34  ;;  %vm730_vm7 = vcmp.eq.f32.partialorder %v729_v0, 8.507059e+37 }
 0x339   :  { %v1476_v19 = vpop.eup %1475 }
 0x33a   :  { %v1478_v53 = vpop.eup %1477  ;;  %v721_v42 = vmul.f32 %v1476_v19, %v719_v18  ;;  %vm726_vm4 = vweird.f32 %v1476_v19  ;;  %v2225_v18 = vld [vmem:[#allocation8 + $0x20] sm:$0xff] }
 0x33b   :  { %v741_v51 = vmul.f32 %v1478_v53, %v739_v16  ;;  %vm727_vm6 = vmor %vm725_vm5, %vm726_vm4  ;;  %vm746_vm8 = vweird.f32 %v1478_v53  ;;  %v1537_v16 = vld [vmem:[#allocation6 + $0x28] sm:$0xff] }
 0x33c   :  { %v722_v54 = vsub.f32 1.0, %v721_v42  ;;  %vm747_vm10 = vmor %vm745_vm9, %vm746_vm8  ;;  %v2228_v42 = vld [vmem:[#allocation8 + $0x18] sm:$0xff] }
 0x33d   :  { %v742_v39 = vsub.f32 1.0, %v741_v51 }
 0x33e   :  { %v723_v48 = vmul.f32 %v1476_v19, %v722_v54  ;;  %v1542_v54 = vld [vmem:[#allocation3 + $0x18] sm:$0xff] }
 0x33f   :  { %v743_v61 = vmul.f32 %v1478_v53, %v742_v39 }
 0x340   :  { %v724_v3 = vadd.f32 %v1476_v19, %v723_v48 }
 0x341   :  { %v744_v41 = vadd.f32 %v1478_v53, %v743_v61 }
 0x342   :  { %v728_v46 = vsel %vm727_vm6, %v1476_v19, %v724_v3  ;;  %v1539_v19 = vld [vmem:[#allocation3 + $0x20] sm:$0xff] }
 0x343   :  { %v733_v50 = vsel %vm730_vm7, %v732_v43, %v728_v46  ;;  %v748_v7 = vsel %vm747_vm10, %v1478_v53, %v744_v41  ;;  %v1540_v53 = vld [vmem:[#allocation6 + $0x20] sm:$0xff] }
 0x344   :  { %v755_v17 = vmul.f32 %v733_v50, %v713_v45  ;;  %v753_v5 = vsel %vm750_vm11, %v752_v1, %v748_v7 }
 0x346   :  { %v756_v63 = vadd.f32 %v755_v17, %v652_v33 }
 0x348   :  { %1479 = vtanh.f32 %v756_v63 }
 0x34e   :  { %v1480_v44 = vpop.eup %1479 }
 0x34f   :  { %v758_v52 = vsub.f32 %v2147_v32, %v1480_v44  ;;  %v1530_v32 = vld [vmem:[#allocation3 + $0x38] sm:$0xff] }
 0x351   :  { %v759_v8 = vmul.f32 %v758_v52, %v753_v5 }
 0x353   :  { %v2201_v9 = vadd.f32 %v1480_v44, %v759_v8 }
 0x355   :  { %1408 = vmatmul.msk.f32.vlgmr.msra.gmra.mxu2 %vm228_vm12, %v2201_v9  ;;  %764 = vst.msk [vmem:[#allocation2 + $0x3] sm:$0x1] %vm344_vm13, %v2201_v9  ;;  %1409 = vmatmul.msk.f32.vlgmr.msrb.gmra.mxu3 %vm228_vm12, %v2201_v9  ;;  %v762_v55 = vrot.slane %v2201_v9, 1 }
 0x356   :  { %766 = vst.msk [vmem:[#allocation2 + $0x4] sm:$0x1] %vm347_vm14, %v2201_v9  ;;  %1410 = vmatmul.msk.f32.vlgmr.msra.gmra.mxu0 %vm228_vm12, %v2201_v9  ;;  %1057 = vmatpush.msra.mxu2 %v2214_v57 }
 0x357   :  { %1135 = vmatpush.msrb.mxu3 %v1530_v32  ;;  %1155 = vmatpush.msra.mxu0 %v1531_v10  ;;  %765 = vst.msk [vmem:[#allocation2 + $0xb] sm:$0x1] %vm344_vm13, %v762_v55  ;;  %v1544_v10 = vld [vmem:[#allocation8 + $0x8] sm:$0xff] }
 0x358   :  { %1058 = vmatpush.msra.mxu2 %v2218_v11  ;;  %767 = vst.msk [vmem:[#allocation2 + $0xc] sm:$0x1] %vm347_vm14, %v762_v55 }
 0x359   :  { %1136 = vmatpush.msrb.mxu3 %v1533_v12  ;;  %1156 = vmatpush.msra.mxu0 %v1534_v13  ;;  %v1545_v12 = vld [vmem:[#allocation8] sm:$0xff] }
 0x35a   :  { %1059 = vmatpush.msra.mxu2 %v2222_v14 }
 0x35b   :  { %1137 = vmatpush.msrb.mxu3 %v1536_v15  ;;  %1157 = vmatpush.msra.mxu0 %v1537_v16 }
 0x35c   :  { %1060 = vmatpush.msra.mxu2 %v2225_v18 }
 0x35d   :  { %1138 = vmatpush.msrb.mxu3 %v1539_v19  ;;  %1158 = vmatpush.msra.mxu0 %v1540_v53 }
 0x35e   :  { %1061 = vmatpush.msra.mxu2 %v2228_v42 }
 0x35f   :  { %1139 = vmatpush.msrb.mxu3 %v1542_v54  ;;  %1159 = vmatpush.msra.mxu0 %v1820_v20  ;;  %v769_v20 = vsel %vm199_vm3, %v2188_v4, %v2186_v2 }
 0x360   :  { %1062 = vmatpush.msra.mxu2 %v1826_v22 }
 0x361   :  { %1140 = vmatpush.msrb.mxu3 %v1824_v21  ;;  %1160 = vmatpush.msra.mxu0 %v1874_v27 }
 0x362   :  { %1063 = vmatpush.msra.mxu2 %v1832_v24 }
 0x363   :  { %1141 = vmatpush.msrb.mxu3 %v1830_v23  ;;  %1161 = vmatpush.msra.mxu0 %v1877_v28 }
 0x364   :  { %1064 = vmatpush.msra.mxu2 %v1840_v26 }
 0x365   :  { %1142 = vmatpush.msrb.mxu3 %v1838_v25  ;;  %1162 = vmatpush.msra.mxu0 %v1880_v29 }
 0x3d3   :  { %v830_v39 = vpop.f32.mrf.mxu0 }
 0x3d4   :  { %v831_v50 = vadd.f32 %v2036_v62, %v830_v39 }
 0x3d8   :  { %v790_v51 = vpop.f32.mrf.mxu2  ;;  %v810_v21 = vpop.f32.mrf.mxu3 }
 0x3d9   :  { %v833_v22 = vadd.f32 %v790_v51, %v1950_v6  ;;  %v853_v24 = vadd.f32 %v810_v21, %v769_v20 }
 0x3db   :  { %v1411_v27 = vmul.f32 -1.442695, %v833_v22  ;;  %v1412_v23 = vmul.f32 -1.442695, %v853_v24 }
 0x3dd   :  { %1481 = vpow2.f32 %v1411_v27 }
 0x3de   :  { %1483 = vpow2.f32 %v1412_v23 }
 0x3e3   :  { %v1482_v28 = vpop.eup %1481 }
 0x3e4   :  { %v1484_v26 = vpop.eup %1483  ;;  %v837_v34 = vadd.f32 1.0, %v1482_v28 }
 0x3e5   :  { %v857_v25 = vadd.f32 1.0, %v1484_v26 }
 0x3e6   :  { %1485 = vrcp.f32 %v837_v34  ;;  %v849_v3 = vand.u32 2147483648, %v837_v34  ;;  %v847_v6 = vand.u32 2147483647, %v837_v34  ;;  %vm843_vm0 = vweird.f32 %v837_v34 }
 0x3e7   :  { %1487 = vrcp.f32 %v857_v25  ;;  %v869_v38 = vand.u32 2147483648, %v857_v25  ;;  %vm863_vm5 = vweird.f32 %v857_v25  ;;  %v867_v7 = vand.u32 2147483647, %v857_v25 }
 0x3e8   :  { %v850_v45 = vor.u32 1.1754944e-38, %v849_v3  ;;  %vm848_vm2 = vcmp.eq.f32.partialorder %v847_v6, 8.507059e+37 }
 0x3e9   :  { %v870_v52 = vor.u32 1.1754944e-38, %v869_v38  ;;  %vm868_vm7 = vcmp.eq.f32.partialorder %v867_v7, 8.507059e+37 }
 0x3ec   :  { %v1486_v29 = vpop.eup %1485 }
 0x3ed   :  { %v1488_v48 = vpop.eup %1487  ;;  %v839_v0 = vmul.f32 %v1486_v29, %v837_v34  ;;  %vm844_vm15 = vweird.f32 %v1486_v29 }
 0x3ee   :  { %v859_v2 = vmul.f32 %v1488_v48, %v857_v25  ;;  %vm845_vm1 = vmor %vm843_vm0, %vm844_vm15  ;;  %vm864_vm4 = vweird.f32 %v1488_v48 }
 0x3ef   :  { %v840_v36 = vsub.f32 1.0, %v839_v0  ;;  %vm865_vm6 = vmor %vm863_vm5, %vm864_vm4 }
 0x3f0   :  { %v860_v46 = vsub.f32 1.0, %v859_v2 }
 0x3f1   :  { %v841_v4 = vmul.f32 %v1486_v29, %v840_v36 }
 0x3f2   :  { %v861_v63 = vmul.f32 %v1488_v48, %v860_v46 }
 0x3f3   :  { %v842_v43 = vadd.f32 %v1486_v29, %v841_v4 }
 0x3f4   :  { %v862_v40 = vadd.f32 %v1488_v48, %v861_v63 }
 0x3f5   :  { %v846_v17 = vsel %vm845_vm1, %v1486_v29, %v842_v43 }
 0x3f6   :  { %v851_v61 = vsel %vm848_vm2, %v850_v45, %v846_v17  ;;  %v866_v44 = vsel %vm865_vm6, %v1488_v48, %v862_v40 }
 0x3f7   :  { %v873_v33 = vmul.f32 %v851_v61, %v831_v50  ;;  %v871_v8 = vsel %vm868_vm7, %v870_v52, %v866_v44 }
 0x3f9   :  { %v874_v41 = vadd.f32 %v873_v33, %v2015_v60 }
 0x3fb   :  { %1489 = vtanh.f32 %v874_v41 }
 0x401   :  { %v1490_v1 = vpop.eup %1489 }
 0x402   :  { %v876_v5 = vsub.f32 %v2201_v9, %v1490_v1  ;;  %v1543_v9 = vld [vmem:[#allocation8 + $0x10] sm:$0xff] }
 0x404   :  { %v877_v55 = vmul.f32 %v876_v5, %v871_v8 }
 0x406   :  { %v2249_v32 = vadd.f32 %v1490_v1, %v877_v55 }
 0x408   :  { %882 = vst.msk [vmem:[#allocation2 + $0x4] sm:$0x1] %vm344_vm13, %v2249_v32  ;;  %1413 = vmatmul.msk.f32.vlgmr.msrb.gmra.mxu1 %vm228_vm12, %v2249_v32  ;;  %1414 = vmatmul.msk.f32.vlgmr.msrb.gmra.mxu2 %vm228_vm12, %v2249_v32  ;;  %v880_v60 = vrot.slane %v2249_v32, 1 }
 0x409   :  { %884 = vst.msk [vmem:[#allocation2 + $0x3] sm:$0x1] %vm347_vm14, %v2249_v32  ;;  %1415 = vmatmul.msk.f32.vlgmr.msra.gmra.mxu3 %vm228_vm12, %v2249_v32  ;;  %1175 = vmatpush.msrb.mxu1 %v2214_v57 }
 0x40a   :  { %883 = vst.msk [vmem:[#allocation2 + $0xc] sm:$0x1] %vm344_vm13, %v880_v60 }
 0x40b   :  { %1176 = vmatpush.msrb.mxu1 %v2218_v11  ;;  %885 = vst.msk [vmem:[#allocation2 + $0xb] sm:$0x1] %vm347_vm14, %v880_v60  ;;  %v887_v11 = vsel %vm199_vm3, %v2134_v37, %v2132_v49 }
 0x40d   :  { %1177 = vmatpush.msrb.mxu1 %v2222_v14 }
 0x40f   :  { %1178 = vmatpush.msrb.mxu1 %v2225_v18 }
 0x411   :  { %1179 = vmatpush.msrb.mxu1 %v2228_v42 }
 0x413   :  { %1180 = vmatpush.msrb.mxu1 %v1543_v9 }
 0x415   :  { %1181 = vmatpush.msrb.mxu1 %v1544_v10 }
 0x417   :  { %1182 = vmatpush.msrb.mxu1 %v1545_v12 }
 0x485   :  { %v908_v13 = vpop.f32.mrf.mxu1 }
 0x486   :  { %v951_v57 = vadd.f32 %v908_v13, %v1954_v30 }
 0x488   :  { %v1416_v15 = vmul.f32 -1.442695, %v951_v57 }
 0x48a   :  { %1491 = vpow2.f32 %v1416_v15 }
 0x48b   :  { %v928_v14 = vpop.f32.mrf.mxu2 }
 0x48c   :  { %v971_v16 = vadd.f32 %v928_v14, %v887_v11  ;;  %v948_v35 = vpop.f32.mrf.mxu3 }
 0x48d   :  { %v949_v26 = vadd.f32 %v2036_v62, %v948_v35  ;;  %v1257_v35 = vld [vmem:[#allocation9 + $0x78] sm:$0xff] }
 0x48e   :  { %v1417_v18 = vmul.f32 -1.442695, %v971_v16  ;;  %1262 = vmatpush.msrb.mxu2 %v1257_v35 }
 0x490   :  { %v1492_v19 = vpop.eup %1491  ;;  %1493 = vpow2.f32 %v1417_v18 }
 0x491   :  { %v955_v53 = vadd.f32 1.0, %v1492_v19 }
 0x493   :  { %1495 = vrcp.f32 %v955_v53  ;;  %v967_v21 = vand.u32 2147483648, %v955_v53  ;;  %v965_v24 = vand.u32 2147483647, %v955_v53  ;;  %vm961_vm3 = vweird.f32 %v955_v53 }
 0x495   :  { %v968_v23 = vor.u32 1.1754944e-38, %v967_v21  ;;  %vm966_vm10 = vcmp.eq.f32.partialorder %v965_v24, 8.507059e+37 }
 0x496   :  { %v1494_v42 = vpop.eup %1493 }
 0x497   :  { %v975_v54 = vadd.f32 1.0, %v1494_v42 }
 0x499   :  { %v1496_v51 = vpop.eup %1495  ;;  %1497 = vrcp.f32 %v975_v54  ;;  %v987_v3 = vand.u32 2147483648, %v975_v54  ;;  %vm981_vm15 = vweird.f32 %v975_v54  ;;  %v985_v2 = vand.u32 2147483647, %v975_v54 }
 0x49a   :  { %v957_v20 = vmul.f32 %v1496_v51, %v955_v53  ;;  %vm962_vm8 = vweird.f32 %v1496_v51 }
 0x49b   :  { %vm963_vm9 = vmor %vm961_vm3, %vm962_vm8  ;;  %v988_v39 = vor.u32 1.1754944e-38, %v987_v3  ;;  %vm986_vm1 = vcmp.eq.f32.partialorder %v985_v2, 8.507059e+37  ;;  %v1250_v3 = vld [vmem:[#allocation9 + $0x40] sm:$0xff] }
 0x49c   :  { %v958_v30 = vsub.f32 1.0, %v957_v20 }
 0x49e   :  { %v959_v22 = vmul.f32 %v1496_v51, %v958_v30 }
 0x49f   :  { %v1498_v27 = vpop.eup %1497 }
 0x4a0   :  { %v977_v49 = vmul.f32 %v1498_v27, %v975_v54  ;;  %v960_v37 = vadd.f32 %v1496_v51, %v959_v22  ;;  %vm982_vm11 = vweird.f32 %v1498_v27 }
 0x4a1   :  { %vm983_vm0 = vmor %vm981_vm15, %vm982_vm11 }
 0x4a2   :  { %v978_v28 = vsub.f32 1.0, %v977_v49  ;;  %v964_v34 = vsel %vm963_vm9, %v1496_v51, %v960_v37  ;;  %v1256_v37 = vld [vmem:[#allocation9 + $0x70] sm:$0xff] }
 0x4a3   :  { %v969_v25 = vsel %vm966_vm10, %v968_v23, %v964_v34  ;;  %1263 = vmatpush.msrb.mxu2 %v1256_v37 }
 0x4a4   :  { %v991_v29 = vmul.f32 %v969_v25, %v949_v26  ;;  %v979_v48 = vmul.f32 %v1498_v27, %v978_v28  ;;  %v1255_v28 = vld [vmem:[#allocation9 + $0x68] sm:$0xff]  ;;  %v2342_v26 = vld [vmem:[#allocation16_spill] sm:$0xff]  ;;  %v1254_v25 = vld [vmem:[#allocation9 + $0x60] sm:$0xff] }
 0x4a5   :  { %1264 = vmatpush.msrb.mxu2 %v1255_v28 }
 0x4a6   :  { %v992_v0 = vadd.f32 %v991_v29, %v2000_v56  ;;  %v980_v36 = vadd.f32 %v1498_v27, %v979_v48  ;;  %v1253_v48 = vld [vmem:[#allocation9 + $0x58] sm:$0xff] }
 0x4a7   :  { %1265 = vmatpush.msrb.mxu2 %v1254_v25 }
 0x4a8   :  { %1499 = vtanh.f32 %v992_v0  ;;  %v984_v4 = vsel %vm983_vm0, %v1498_v27, %v980_v36  ;;  %v1252_v0 = vld [vmem:[#allocation9 + $0x50] sm:$0xff]  ;;  %v1251_v36 = vld [vmem:[#allocation9 + $0x48] sm:$0xff] }
 0x4a9   :  { %v989_v45 = vsel %vm986_vm1, %v988_v39, %v984_v4  ;;  %1266 = vmatpush.msrb.mxu2 %v1253_v48  ;;  %v1249_v39 = vld [vmem:[#allocation9 + $0x38] sm:$0xff] }
 0x4ab   :  { %1267 = vmatpush.msrb.mxu2 %v1252_v0 }
 0x4ad   :  { %1268 = vmatpush.msrb.mxu2 %v1251_v36 }
 0x4ae   :  { %v1500_v6 = vpop.eup %1499 }
 0x4af   :  { %v994_v43 = vsub.f32 %v2249_v32, %v1500_v6  ;;  %1269 = vmatpush.msrb.mxu2 %v1250_v3 }
 0x4b1   :  { %v995_v46 = vmul.f32 %v994_v43, %v989_v45  ;;  %1270 = vmatpush.msrb.mxu2 %v1249_v39  ;;  %v1248_v43 = vld [vmem:[#allocation9 + $0x30] sm:$0xff]  ;;  %v1247_v45 = vld [vmem:[#allocation9 + $0x28] sm:$0xff] }
 0x4b3   :  { %v996_v50 = vadd.f32 %v1500_v6, %v995_v46  ;;  %1271 = vmatpush.msrb.mxu2 %v1248_v43  ;;  %v1246_v46 = vld [vmem:[#allocation9 + $0x20] sm:$0xff] }
 0x4b5   :  { %v998_v17 = vrot.slane %v996_v50, 1  ;;  %1000 = vst.msk [vmem:[#allocation2 + $0x5] sm:$0x1] %vm344_vm13, %v996_v50  ;;  %1418 = vmatmul.msk.f32.vlgmr.msrb.gmra.mxu0 %vm228_vm12, %v996_v50  ;;  %1419 = vmatmul.msk.f32.vlgmr.msra.gmra.mxu1 %vm228_vm12, %v996_v50 }
 0x4b6   :  { %1002 = vst.msk [vmem:[#allocation2 + $0x2] sm:$0x1] %vm347_vm14, %v996_v50  ;;  %1420 = vmatmul.msk.f32.vlgmr.msra.gmra.mxu2 %vm228_vm12, %v996_v50 }
 0x4b7   :  { %1001 = vst.msk [vmem:[#allocation2 + $0xd] sm:$0x1] %vm344_vm13, %v998_v17  ;;  %1272 = vmatpush.msrb.mxu2 %v1247_v45 }
 0x4b8   :  { %1003 = vst.msk [vmem:[#allocation2 + $0xa] sm:$0x1] %vm347_vm14, %v998_v17 }
 0x4b9   :  { %1273 = vmatpush.msrb.mxu2 %v1246_v46 }
 0x532   :  { %v1026_v56 = vpop.f32.mrf.mxu0  ;;  %v1046_v61 = vpop.f32.mrf.mxu1 }
 0x533   :  { %v1069_v33 = vadd.f32 %v1026_v56, %v1958_v31  ;;  %v1089_v63 = vadd.f32 %v1046_v61, %v2025_v58  ;;  %v1244_v56 = vld [vmem:[#allocation9 + $0x10] sm:$0xff] }
 0x535   :  { %v1421_v41 = vmul.f32 -1.442695, %v1069_v33  ;;  %v1422_v40 = vmul.f32 -1.442695, %v1089_v63  ;;  %v1243_v63 = vld [vmem:[#allocation9 + $0x8] sm:$0xff] }
 0x537   :  { %1501 = vpow2.f32 %v1421_v41 }
 0x538   :  { %1503 = vpow2.f32 %v1422_v40 }
 0x539   :  { %v1066_v58 = vpop.f32.mrf.mxu2 }
 0x53a   :  { %v1067_v57 = vadd.f32 %v2036_v62, %v1066_v58 }
 0x53d   :  { %v1502_v38 = vpop.eup %1501 }
 0x53e   :  { %v1504_v7 = vpop.eup %1503  ;;  %v1073_v44 = vadd.f32 1.0, %v1502_v38 }
 0x53f   :  { %v1093_v1 = vadd.f32 1.0, %v1504_v7  ;;  %v1242_v7 = vld [vmem:[#allocation9] sm:$0xff] }
 0x540   :  { %1505 = vrcp.f32 %v1073_v44  ;;  %v1085_v60 = vand.u32 2147483648, %v1073_v44  ;;  %v1083_v31 = vand.u32 2147483647, %v1073_v44  ;;  %vm1079_vm4 = vweird.f32 %v1073_v44 }
 0x541   :  { %1507 = vrcp.f32 %v1093_v1  ;;  %v1105_v53 = vand.u32 2147483648, %v1093_v1  ;;  %vm1099_vm8 = vweird.f32 %v1093_v1  ;;  %v1103_v42 = vand.u32 2147483647, %v1093_v1 }
 0x542   :  { %v1086_v13 = vor.u32 1.1754944e-38, %v1085_v60  ;;  %vm1084_vm6 = vcmp.eq.f32.partialorder %v1083_v31, 8.507059e+37 }
 0x543   :  { %v1106_v20 = vor.u32 1.1754944e-38, %v1105_v53  ;;  %vm1104_vm9 = vcmp.eq.f32.partialorder %v1103_v42, 8.507059e+37 }
 0x546   :  { %v1506_v52 = vpop.eup %1505 }
 0x547   :  { %v1508_v5 = vpop.eup %1507  ;;  %v1075_v8 = vmul.f32 %v1506_v52, %v1073_v44  ;;  %vm1080_vm2 = vweird.f32 %v1506_v52 }
 0x548   :  { %v1095_v32 = vmul.f32 %v1508_v5, %v1093_v1  ;;  %vm1081_vm5 = vmor %vm1079_vm4, %vm1080_vm2  ;;  %vm1100_vm7 = vweird.f32 %v1508_v5 }
 0x549   :  { %v1076_v55 = vsub.f32 1.0, %v1075_v8  ;;  %vm1101_vm3 = vmor %vm1099_vm8, %vm1100_vm7 }
 0x54a   :  { %v1096_v12 = vsub.f32 1.0, %v1095_v32  ;;  %v1546_v32 = vld [vmem:[%s2336_s7] ss:$0 sm:$0xff] }
 0x54b   :  { %v1077_v9 = vmul.f32 %v1506_v52, %v1076_v55 }
 0x54c   :  { %v1097_v16 = vmul.f32 %v1508_v5, %v1096_v12  ;;  %v2343_v12 = vld [vmem:[#allocation17_spill] sm:$0xff] }
 0x54d   :  { %v1078_v10 = vadd.f32 %v1506_v52, %v1077_v9 }
 0x54e   :  { %v1098_v19 = vadd.f32 %v1508_v5, %v1097_v16 }
 0x54f   :  { %v1082_v15 = vsel %vm1081_vm5, %v1506_v52, %v1078_v10 }
 0x550   :  { %v1087_v11 = vsel %vm1084_vm6, %v1086_v13, %v1082_v15  ;;  %v1102_v54 = vsel %vm1101_vm3, %v1508_v5, %v1098_v19 }
 0x551   :  { %v1109_v14 = vmul.f32 %v1087_v11, %v1067_v57  ;;  %v1107_v62 = vsel %vm1104_vm9, %v1106_v20, %v1102_v54 }
 0x553   :  { %v1110_v18 = vadd.f32 %v1109_v14, %v2009_v59 }
 0x555   :  { %1509 = vtanh.f32 %v1110_v18 }
 0x55b   :  { %v1510_v51 = vpop.eup %1509 }
 0x55c   :  { %v1112_v30 = vsub.f32 %v996_v50, %v1510_v51  ;;  %v1245_v50 = vld [vmem:[#allocation9 + $0x18] sm:$0xff] }
 0x55d   :  { %1274 = vmatpush.msrb.mxu2 %v1245_v50 }
 0x55e   :  { %v1113_v21 = vmul.f32 %v1112_v30, %v1107_v62  ;;  %v1440_v62 = vld [vmem:[%s2338_s9] ss:$0 sm:$0xff] }
 0x55f   :  { %1275 = vmatpush.msrb.mxu2 %v1244_v56 }
 0x560   :  { %v2288_v22 = vadd.f32 %v1510_v51, %v1113_v21  ;;  %v1285_v21 = vld [vmem:[%s2330_s1] sm:$0xff] }
 0x561   :  { %1276 = vmatpush.msrb.mxu2 %v1243_v63  ;;  %vm1287_vm5 = vcmp.eq.f32.partialorder %v1285_v21, 0.0 }
 0x562   :  { %v1116_v24 = vrot.slane %v2288_v22, 1  ;;  %1118 = vst.msk [vmem:[#allocation2 + $0x6] sm:$0x1] %vm344_vm13, %v2288_v22  ;;  %1423 = vmatmul.msk.f32.vlgmr.msrb.gmra.mxu3 %vm228_vm12, %v2288_v22  ;;  %1424 = vmatmul.msk.f32.vlgmr.msra.gmra.mxu0 %vm228_vm12, %v2288_v22 }
 0x563   :  { %1120 = vst.msk [vmem:[#allocation2 + $0x1] sm:$0x1] %vm347_vm14, %v2288_v22  ;;  %1425 = vmatmul.msk.f32.vlgmr.msrb.gmra.mxu1 %vm228_vm12, %v2288_v22  ;;  %1277 = vmatpush.msrb.mxu2 %v1242_v7 }
 0x564   :  { %1119 = vst.msk [vmem:[#allocation2 + $0xe] sm:$0x1] %vm344_vm13, %v1116_v24 }
 0x565   :  { %1121 = vst.msk [vmem:[#allocation2 + $0x9] sm:$0x1] %vm347_vm14, %v1116_v24 }
 0x5df   :  { %v1164_v59 = vpop.f32.mrf.mxu0 }
 0x5e0   :  { %v1207_v27 = vadd.f32 %v1164_v59, %v2031_v47  ;;  %v1184_v52 = vpop.f32.mrf.mxu1 }
 0x5e1   :  { %v1185_v60 = vadd.f32 %v1546_v32, %v1184_v52 }
 0x5e2   :  { %v1427_v49 = vmul.f32 -1.442695, %v1207_v27  ;;  %v1286_v27 = vld [vmem:[%s2330_s1 + $0x8] sm:$0xff]  ;;  %s1683_s1 = smov [#allocation11]  }
 0x5e3   :  { %s1368_s9 = sshll.u32 %s1683_s1, 4  ;;  %s1369_s9 = int_to_ptr.vmem [resolvable:$true] %s1368_s9 }
 0x5e4   :  { %1511 = vpow2.f32 %v1427_v49 }
 0x5e5   :  { %v1144_v23 = vpop.f32.mrf.mxu3 }
 0x5e6   :  { %v1187_v34 = vadd.f32 %v1144_v23, %v2342_v26 }
 0x5e8   :  { %v1426_v29 = vmul.f32 -1.442695, %v1187_v34 }
 0x5ea   :  { %1513 = vpow2.f32 %v1426_v29  ;;  %v1512_v47 = vpop.eup %1511 }
 0x5eb   :  { %v1211_v4 = vadd.f32 1.0, %v1512_v47 }
 0x5ed   :  { %v1223_v15 = vand.u32 2147483648, %v1211_v4  ;;  %vm1217_vm1 = vweird.f32 %v1211_v4  ;;  %v1221_v11 = vand.u32 2147483647, %v1211_v4 }
 0x5ef   :  { %v1224_v18 = vor.u32 1.1754944e-38, %v1223_v15  ;;  %vm1222_vm4 = vcmp.eq.f32.partialorder %v1221_v11, 8.507059e+37 }
 0x5f0   :  { %v1514_v2 = vpop.eup %1513 }
 0x5f1   :  { %v1191_v6 = vadd.f32 1.0, %v1514_v2 }
 0x5f3   :  { %1515 = vrcp.f32 %v1191_v6  ;;  %v1203_v38 = vand.u32 2147483648, %v1191_v6  ;;  %v1201_v1 = vand.u32 2147483647, %v1191_v6  ;;  %vm1197_vm10 = vweird.f32 %v1191_v6 }
 0x5f4   :  { %1517 = vrcp.f32 %v1211_v4 }
 0x5f5   :  { %v1204_v55 = vor.u32 1.1754944e-38, %v1203_v38  ;;  %vm1202_vm15 = vcmp.eq.f32.partialorder %v1201_v1, 8.507059e+37 }
 0x5f9   :  { %v1516_v17 = vpop.eup %1515 }
 0x5fa   :  { %v1518_v61 = vpop.eup %1517  ;;  %v1193_v33 = vmul.f32 %v1516_v17, %v1191_v6  ;;  %vm1198_vm12 = vweird.f32 %v1516_v17 }
 0x5fb   :  { %v1213_v40 = vmul.f32 %v1518_v61, %v1211_v4  ;;  %vm1199_vm11 = vmor %vm1197_vm10, %vm1198_vm12  ;;  %vm1218_vm0 = vweird.f32 %v1518_v61 }
 0x5fc   :  { %v1194_v41 = vsub.f32 1.0, %v1193_v33  ;;  %vm1219_vm2 = vmor %vm1217_vm1, %vm1218_vm0 }
 0x5fd   :  { %v1214_v8 = vsub.f32 1.0, %v1213_v40 }
 0x5fe   :  { %v1195_v44 = vmul.f32 %v1516_v17, %v1194_v41 }
 0x5ff   :  { %v1215_v10 = vmul.f32 %v1518_v61, %v1214_v8 }
 0x600   :  { %v1196_v5 = vadd.f32 %v1516_v17, %v1195_v44 }
 0x601   :  { %v1216_v57 = vadd.f32 %v1518_v61, %v1215_v10 }
 0x602   :  { %v1200_v9 = vsel %vm1199_vm11, %v1516_v17, %v1196_v5 }
 0x603   :  { %v1205_v31 = vsel %vm1202_vm15, %v1204_v55, %v1200_v9  ;;  %v1220_v14 = vsel %vm1219_vm2, %v1518_v61, %v1216_v57 }
 0x604   :  { %v1227_v58 = vmul.f32 %v1205_v31, %v1185_v60  ;;  %v1225_v53 = vsel %vm1222_vm4, %v1224_v18, %v1220_v14 }
 0x606   :  { %v1228_v13 = vadd.f32 %v1227_v58, %v2343_v12 }
 0x608   :  { %1519 = vtanh.f32 %v1228_v13 }
 0x60e   :  { %v1520_v16 = vpop.eup %1519 }
 0x60f   :  { %v1230_v19 = vsub.f32 %v2288_v22, %v1520_v16 }
 0x611   :  { %v1231_v42 = vmul.f32 %v1230_v19, %v1225_v53 }
 0x613   :  { %v1232_v54 = vadd.f32 %v1520_v16, %v1231_v42 }
 0x615   :  { %v1234_v51 = vrot.slane %v1232_v54, 1  ;;  %1236 = vst.msk [vmem:[#allocation2 + $0x7] sm:$0x1] %vm344_vm13, %v1232_v54 }
 0x616   :  { %1238 = vst.msk [vmem:[#allocation2] sm:$0x1] %vm347_vm14, %v1232_v54 }
 0x617   :  { %1237 = vst.msk [vmem:[#allocation2 + $0xf] sm:$0x1] %vm344_vm13, %v1234_v51  ;;  %vm1288_vm13 = vcmp.eq.f32.partialorder %v1286_v27, 0.0 }
 0x618   :  { %1239 = vst.msk [vmem:[#allocation2 + $0x8] sm:$0x1] %vm347_vm14, %v1234_v51  ;;  %vm1315_vm14 = vcmask 64512  }
 0x61d   :  { %v1240_v20 = vld [vmem:[#allocation2] sm:$0xff] }
 0x61e   :  { %1278 = vmatmul.f32.vlgmr.msrb.gmra.mxu2 %v1240_v20  ;;  %1334 = vmatpush.msra.mxu3 %v1240_v20 }
 0x61f   :  { %v1241_v30 = vld [vmem:[#allocation2 + $0x8] sm:$0xff] }
 0x620   :  { %1357 = vmatpush.msrb.mxu0 %v1241_v30 }
 0x626   :  { %1281 = vmatmul.f32.gmra.mxu2 %v1241_v30 }
 0x6a1   :  { %v1279_v22 = vpop.f32.mrf.mxu2 }
 0x6a2   :  { %v1280_v24 = vadd.f32 %v1440_v62, %v1279_v22 }
 0x6a4   :  { %v1289_v59 = vsel %vm1287_vm5, -9999999.0, %v1280_v24 }
 0x6a5   :  { %1291 = vmax.xlane.f32.xlu2 %v1289_v59 }
 0x6a9   :  { %v1282_v35 = vpop.f32.mrf.mxu2 }
 0x6aa   :  { %v1283_v49 = vadd.f32 %v1440_v62, %v1282_v35 }
 0x6ac   :  { %v1290_v37 = vsel %vm1288_vm13, -9999999.0, %v1283_v49 }
 0x6ad   :  { %1293 = vmax.xlane.f32.xlu0 %v1290_v37 }
 0x718   :  { %v1292_v23 = vpop.xlane.xlu2 %1291 }
 0x719   :  { %v1295_v28 = vsub.f32 %v1289_v59, %v1292_v23 }
 0x71b   :  { %v1297_v26 = vmul.f32 1.442695, %v1295_v28 }
 0x71d   :  { %1521 = vpow2.f32 %v1297_v26 }
 0x720   :  { %v1294_v34 = vpop.xlane.xlu0 %1293 }
 0x721   :  { %v1296_v25 = vsub.f32 %v1290_v37, %v1294_v34 }
 0x723   :  { %v1522_v29 = vpop.eup %1521  ;;  %v1299_v48 = vmul.f32 1.442695, %v1296_v25 }
 0x724   :  { %1301 = vadd.xlane.f32.xlu1 %v1522_v29 }
 0x725   :  { %1523 = vpow2.f32 %v1299_v48 }
 0x72b   :  { %v1524_v0 = vpop.eup %1523 }
 0x72c   :  { %1303 = vadd.xlane.f32.xlu2 %v1524_v0 }
 0x797   :  { %v1302_v47 = vpop.xlane.xlu1 %1301 }
 0x798   :  { %1525 = vrcp.f32 %v1302_v47 }
 0x79e   :  { %v1526_v36 = vpop.eup %1525 }
 0x79f   :  { %v1307_v3 = vmul.f32 %v1526_v36, %v1302_v47  ;;  %v1304_v2 = vpop.xlane.xlu2 %1303 }
 0x7a0   :  { %1527 = vrcp.f32 %v1304_v2 }
 0x7a1   :  { %v1309_v4 = vsub.f32 2.0, %v1307_v3 }
 0x7a3   :  { %v1311_v6 = vmul.f32 %v1526_v36, %v1309_v4 }
 0x7a5   :  { %v1313_v39 = vmul.f32 %v1522_v29, %v1311_v6 }
 0x7a6   :  { %v1528_v43 = vpop.eup %1527 }
 0x7a7   :  { %v1308_v45 = vmul.f32 %v1528_v43, %v1304_v2  ;;  %1428 = vmatmul.msk.f32.vlgmr.msra.gmra.mxu3 %vm1315_vm14, %v1313_v39 }
 0x7a9   :  { %v1310_v46 = vsub.f32 2.0, %v1308_v45 }
 0x7ab   :  { %v1312_v50 = vmul.f32 %v1528_v43, %v1310_v46 }
 0x7ad   :  { %v1314_v17 = vmul.f32 %v1524_v0, %v1312_v50 }
 0x7af   :  { %1429 = vmatmul.msk.f32.vlgmr.msrb.gmra.mxu0 %vm1315_vm14, %v1314_v17 }
 0x82a   :  { %v1336_v56 = vpop.f32.mrf.mxu3 }
 0x82b   :  { %1362 = vst [vmem:[#allocation11] sm:$0xff] %v1336_v56 }
 0x82c   :  { %v1359_v61 = vpop.f32.mrf.mxu0 }
 0x82d   :  { %1363 = vst [vmem:[#allocation11 + $0x8] sm:$0xff] %v1359_v61 }
 0x82e   :  { %1376 = dma.vmem_to_hbm [thread:$0]  %s1369_s9, 256, %s1371_s28, [#allocation5], %s1676_s21, %s1676_s21, %s1677_s22  }
 0x82f   :  { %1673 = dma.done.wait [#allocation5], 256  }
 0x830   :  { %1674 = vsyncadd [#allocation5], 4294967040 }
 0x831   :  { %1381 = vsyncpa [#allocation4], 1 }
 0x832   :  { %1382 = vsyncpa [#allocation7], 1 }
 0x833   :  { %1383 = vsyncpa [#allocation10], 1 }
 0x834   :  { %1384 = vsyncpa [#allocation5], 1 }

</bundles_post_ra>
